<compile_context>
chip_gen: v7x
topology: tpu7x:2x2x1
jax: 0.10.0
libtpu: 0.0.40
codegen_flags: <defaults>
</compile_context>

<pallas_src>
import jax
import jax.numpy as jnp
from jax.experimental import pallas as pl
from jax.experimental.pallas import tpu as pltpu

EMB = 32        # self.embedding_size
PAD_IN = 256    # padded input feature width (133 -> 256)


# ----------------------------------------------------------------------------
# Kernel factory (offsets / sizes are static Python ints baked via closure)
# ----------------------------------------------------------------------------
def _make_kernel(T, H, offs128, offs256):
    o_wbr, o_wih, o_wo2, o_whh, o_bbr, o_bg, o_bo2 = offs128
    o_wh1, o_wo1, o_bh1, o_bo1 = offs256

    def kernel(x_ref, hc0_ref, s128_ref, s256_ref, out_ref, hseq_ref, xall_ref):
        relu = lambda v: jnp.maximum(v, 0.0)
        dot = lambda a, b: jnp.dot(a, b, preferred_element_type=jnp.float32)

        # --- fused late-fusion branches (block-diagonal weight) + ReLU -------
        xcat = relu(dot(x_ref[...], s128_ref[o_wbr:o_wbr + PAD_IN, :])
                    + s128_ref[o_bbr:o_bbr + 1, :])                  # (T, 128)

        # --- hidden1 ---------------------------------------------------------
        xe = relu(dot(xcat, s256_ref[o_wh1:o_wh1 + 4 * EMB, :])
                  + s256_ref[o_bh1:o_bh1 + 1, :])                    # (T, 256)

        # --- LSTM: time-parallel input->gate precompute (to VMEM scratch) ----
        xall_ref[...] = (dot(xe, s128_ref[o_wih:o_wih + 256, :])
                         + s128_ref[o_bg:o_bg + 1, :])               # (T, 4H)

        # --- LSTM recurrence (statically unrolled over T) ---------------------
        w_hh = s128_ref[o_whh:o_whh + H, :]    # (H, 4H), hoisted; single RHS/step
        h = hc0_ref[0:1, :]                    # (1, H)
        c = hc0_ref[1:2, :]                    # (1, H)
        for t in range(T):
            gates = xall_ref[t:t + 1, :] + dot(h, w_hh)              # (1, 4H)
            sg = jax.nn.sigmoid(gates)                               # one EUP pass
            i_g = sg[:, 0:H]
            f_g = sg[:, H:2 * H]
            o_g = sg[:, 3 * H:4 * H]
            g_g = jnp.tanh(gates[:, 2 * H:3 * H])                    # one EUP pass
            c = f_g * c + i_g * g_g
            h = o_g * jnp.tanh(c)
            hseq_ref[t:t + 1, :] = h

        # --- output head (lane-dense 128-wide, zero-padded beyond out_size) --
        z = relu(dot(hseq_ref[...], s256_ref[o_wo1:o_wo1 + H, :])
                 + s256_ref[o_bo1:o_bo1 + 1, :])                     # (T, 256)
        y = dot(z, s128_ref[o_wo2:o_wo2 + 256, :]) + s128_ref[o_bo2:o_bo2 + 1, :]
        out_ref[0:T, :] = y                                          # (T, 128)
        # row T carries hx || cx || zeros  (single lane-dense store)
        out_ref[T:T + 1, :] = jnp.concatenate(
            [h, c, jnp.zeros((1, 128 - 2 * H), jnp.float32)], axis=1)

    return kernel


# ----------------------------------------------------------------------------
# Parameters (deterministic synthetic init; shapes follow the nn.Module)
# ----------------------------------------------------------------------------
def init_params(key, hidden_size_lstm, output_size):
    H = hidden_size_lstm
    keys = jax.random.split(key, 16)

    def lin(k, fan_in, fan_out):
        kw, kb = jax.random.split(k)
        s = 1.0 / jnp.sqrt(fan_in)
        w = jax.random.uniform(kw, (fan_in, fan_out), jnp.float32, -s, s)
        b = jax.random.uniform(kb, (1, fan_out), jnp.float32, -s, s)
        return w, b

    p = {}
    p["w_acp"], p["b_acp"] = lin(keys[0], 33, EMB)
    p["w_acr"], p["b_acr"] = lin(keys[1], 33, EMB)
    p["w_vwm"], p["b_vwm"] = lin(keys[2], 44, EMB)
    p["w_oit"], p["b_oit"] = lin(keys[3], 23, EMB)
    p["w_h1"], p["b_h1"] = lin(keys[4], EMB * 4, 256)

    # LSTM weights (gate order i, f, g, o); biases are 0 per init_lstm_weights
    s_ih = 1.0 / jnp.sqrt(256.0)
    s_hh = 1.0 / jnp.sqrt(float(H))
    for gi, g in enumerate(("i", "f", "g", "o")):
        p[f"w_ih_{g}"] = jax.random.uniform(
            keys[5 + gi], (256, H), jnp.float32, -s_ih, s_ih)
        p[f"w_hh_{g}"] = jax.random.uniform(
            keys[9 + gi], (H, H), jnp.float32, -s_hh, s_hh)
        p[f"b_{g}"] = jnp.zeros((1, H), jnp.float32)

    p["w_o1"], p["b_o1"] = lin(keys[13], H, 256)
    p["w_o2"], p["b_o2"] = lin(keys[14], 256, output_size)
    return p


def pack_params(p):
    """Pack all weights/biases into two lane-dense slabs (host-side glue)."""
    H = p["w_hh_i"].shape[0]
    out_size = p["w_o2"].shape[1]
    assert 4 * EMB == 128 and 4 * H == 128 and out_size <= 128

    # ---- slab128: everything whose lane width is 128 -------------------------
    o_wbr = 0                       # (PAD_IN, 128) block-diag branch weight
    o_wih = o_wbr + PAD_IN          # (256, 4H)   packed input->gate
    o_wo2 = o_wih + 256             # (256, 128)  w_o2 zero-padded to 128 lanes
    o_whh = o_wo2 + 256             # (H, 4H)     packed hidden->gate
    o_bbr = o_whh + ((H + 7) // 8) * 8   # (1, 128) branch bias
    o_bg = o_bbr + 8                # (1, 4H)     combined gate bias
    o_bo2 = o_bg + 8                # (1, 128)    b_o2 zero-padded
    n128 = o_bo2 + 8

    s128 = jnp.zeros((n128, 128), jnp.float32)
    # block-diagonal branch weight (input slicing becomes implicit in the matmul)
    s128 = s128.at[0:33, 0 * EMB:1 * EMB].set(p["w_acp"])
    s128 = s128.at[33:66, 1 * EMB:2 * EMB].set(p["w_acr"])
    s128 = s128.at[66:110, 2 * EMB:3 * EMB].set(p["w_vwm"])
    s128 = s128.at[110:133, 3 * EMB:4 * EMB].set(p["w_oit"])
    # packed LSTM weights, gate order (i, f, g, o)
    w_ih = jnp.concatenate(
        [p["w_ih_i"], p["w_ih_f"], p["w_ih_g"], p["w_ih_o"]], axis=1)   # (256, 4H)
    w_hh = jnp.concatenate(
        [p["w_hh_i"], p["w_hh_f"], p["w_hh_g"], p["w_hh_o"]], axis=1)   # (H, 4H)
    b_gates = jnp.concatenate(
        [p["b_i"], p["b_f"], p["b_g"], p["b_o"]], axis=1)               # (1, 4H)
    b_branch = jnp.concatenate(
        [p["b_acp"], p["b_acr"], p["b_vwm"], p["b_oit"]], axis=1)       # (1, 128)
    s128 = s128.at[o_wih:o_wih + 256, :].set(w_ih)
    s128 = s128.at[o_wo2:o_wo2 + 256, 0:out_size].set(p["w_o2"])
    s128 = s128.at[o_whh:o_whh + H, :].set(w_hh)
    s128 = s128.at[o_bbr:o_bbr + 1, :].set(b_branch)
    s128 = s128.at[o_bg:o_bg + 1, :].set(b_gates)
    s128 = s128.at[o_bo2:o_bo2 + 1, 0:out_size].set(p["b_o2"])

    # ---- slab256: everything whose lane width is 256 -------------------------
    o_wh1 = 0                       # (4*EMB, 256)
    o_wo1 = o_wh1 + 4 * EMB         # (H, 256)
    o_bh1 = o_wo1 + ((H + 7) // 8) * 8
    o_bo1 = o_bh1 + 8
    n256 = o_bo1 + 8

    s256 = jnp.zeros((n256, 256), jnp.float32)
    s256 = s256.at[o_wh1:o_wh1 + 4 * EMB, :].set(p["w_h1"])
    s256 = s256.at[o_wo1:o_wo1 + H, :].set(p["w_o1"])
    s256 = s256.at[o_bh1:o_bh1 + 1, :].set(p["b_h1"])
    s256 = s256.at[o_bo1:o_bo1 + 1, :].set(p["b_o1"])

    return {
        "slab128": s128, "slab256": s256,
        "offs128": (o_wbr, o_wih, o_wo2, o_whh, o_bbr, o_bg, o_bo2),
        "offs256": (o_wh1, o_wo1, o_bh1, o_bo1),
        "H": H, "out_size": out_size,
    }


# ----------------------------------------------------------------------------
# Wrapper (glue: padding, default hidden, pallas_call plumbing)
# ----------------------------------------------------------------------------
def dqn_lstm_forward(packed, inputs, hidden=None):
    H = packed["H"]
    out_size = packed["out_size"]

    squeeze = inputs.ndim == 2          # module's unbatched (T, 133) path
    if squeeze:
        inputs = inputs[None]
    B, T, F = inputs.shape
    x = jnp.pad(inputs, ((0, 0), (0, 0), (0, PAD_IN - F)))   # zero cols F..255

    if hidden is None:
        hc0 = jnp.zeros((B, 2, H), jnp.float32)
    else:
        h0, c0 = hidden
        hc0 = jnp.stack(
            [jnp.broadcast_to(h0.reshape(-1, H), (B, H)),
             jnp.broadcast_to(c0.reshape(-1, H), (B, H))], axis=1)

    kernel = _make_kernel(T, H, packed["offs128"], packed["offs256"])
    s128, s256 = packed["slab128"], packed["slab256"]

    grid_spec = pltpu.PrefetchScalarGridSpec(
        num_scalar_prefetch=0,
        grid=(B,),
        in_specs=[
            pl.BlockSpec((None, T, PAD_IN), lambda b: (b, 0, 0)),     # x (per-seq)
            pl.BlockSpec((None, 2, H), lambda b: (b, 0, 0)),          # h0 || c0
            pl.BlockSpec(s128.shape, lambda b: (0, 0)),               # weight slab A
            pl.BlockSpec(s256.shape, lambda b: (0, 0)),               # weight slab B
        ],
        out_specs=pl.BlockSpec((None, T + 1, 128), lambda b: (b, 0, 0)),
        scratch_shapes=[pltpu.VMEM((T, H), jnp.float32),              # hidden seq
                        pltpu.VMEM((T, 4 * H), jnp.float32)],         # gate precompute
    )

    out = pl.pallas_call(
        kernel,
        out_shape=jax.ShapeDtypeStruct((B, T + 1, 128), jnp.float32),
        grid_spec=grid_spec,
        compiler_params=pltpu.CompilerParams(
            dimension_semantics=("parallel",)),
    )(x, hc0, s128, s256)

    y = out[:, :T, :out_size]
    hx = out[:, T, 0:H]
    cx = out[:, T, H:2 * H]
    if squeeze:
        y = y[0]                       # (T, out); hx/cx stay (1, H) like the module
    # TODO(synk): the module's stateful self.hidden / self.prevHidden bookkeeping
    # has no in-kernel equivalent; the new hidden is returned functionally.
    return y, (hx, cx)


# ----------------------------------------------------------------------------
# Pure-JAX reference (mirrors the PyTorch forward) for a correctness check
# ----------------------------------------------------------------------------
def ref_forward(params, inputs, h0, c0):
    relu = lambda v: jnp.maximum(v, 0.0)
    x1 = relu(inputs[:, 0:33] @ params["w_acp"] + params["b_acp"])
    x2 = relu(inputs[:, 33:66] @ params["w_acr"] + params["b_acr"])
    x3 = relu(inputs[:, 66:110] @ params["w_vwm"] + params["b_vwm"])
    x4 = relu(inputs[:, 110:133] @ params["w_oit"] + params["b_oit"])
    xe = relu(jnp.concatenate([x1, x2, x3, x4], axis=1) @ params["w_h1"]
              + params["b_h1"])
    h, c = h0, c0
    hs = []
    for t in range(inputs.shape[0]):
        xt = xe[t:t + 1, :]
        i_g = jax.nn.sigmoid(xt @ params["w_ih_i"] + h @ params["w_hh_i"] + params["b_i"])
        f_g = jax.nn.sigmoid(xt @ params["w_ih_f"] + h @ params["w_hh_f"] + params["b_f"])
        g_g = jnp.tanh(xt @ params["w_ih_g"] + h @ params["w_hh_g"] + params["b_g"])
        o_g = jax.nn.sigmoid(xt @ params["w_ih_o"] + h @ params["w_hh_o"] + params["b_o"])
        c = f_g * c + i_g * g_g
        h = o_g * jnp.tanh(c)
        hs.append(h)
    h_seq = jnp.concatenate(hs, axis=0)
    y = relu(h_seq @ params["w_o1"] + params["b_o1"]) @ params["w_o2"] + params["b_o2"]
    return y, h, c


# ----------------------------------------------------------------------------
if __name__ == "__main__":
    key = jax.random.PRNGKey(0)
    pkey, xkey = jax.random.split(key)

    B = 2                     # batch of independent sequences (grid axis)
    T = 8                     # sequence length
    hidden_size_lstm = 32
    output_size = 4

    params = init_params(pkey, hidden_size_lstm, output_size)
    packed = pack_params(params)
    x = jax.random.normal(xkey, (B, T, 133), jnp.float32)

    # batched path
    y, (hx, cx) = dqn_lstm_forward(packed, x)
    jax.block_until_ready((y, hx, cx))

    # reference (per independent sequence, zero initial hidden)
    h0 = jnp.zeros((1, hidden_size_lstm), jnp.float32)
    c0 = jnp.zeros((1, hidden_size_lstm), jnp.float32)
    ys, hs, cs = [], [], []
    for b in range(B):
        yb, hb, cb = ref_forward(params, x[b], h0, c0)
        ys.append(yb); hs.append(hb); cs.append(cb)
    y_ref = jnp.stack(ys, axis=0)
    hx_ref = jnp.concatenate(hs, axis=0)
    cx_ref = jnp.concatenate(cs, axis=0)

    assert y.shape == (B, T, output_size)
    assert hx.shape == (B, hidden_size_lstm) and cx.shape == (B, hidden_size_lstm)
    assert jnp.allclose(y, y_ref, atol=1e-4, rtol=1e-4)
    assert jnp.allclose(hx, hx_ref, atol=1e-4, rtol=1e-4)
    assert jnp.allclose(cx, cx_ref, atol=1e-4, rtol=1e-4)

    # module's unbatched (T, 133) path
    y1, (hx1, cx1) = dqn_lstm_forward(packed, x[0])
    jax.block_until_ready((y1, hx1, cx1))
    assert y1.shape == (T, output_size)
    assert hx1.shape == (1, hidden_size_lstm) and cx1.shape == (1, hidden_size_lstm)
    assert jnp.allclose(y1, ys[0], atol=1e-4, rtol=1e-4)
    assert jnp.allclose(hx1, hs[0], atol=1e-4, rtol=1e-4)
    assert jnp.allclose(cx1, cs[0], atol=1e-4, rtol=1e-4)

    print("KERNEL_OK")
</pallas_src>

<mosaic_0001>
module attributes {stable_mosaic.version = 11 : i64} {
  func.func @kernel(%arg0: i32, %arg1: memref<1x8x256xf32, #tpu.memory_space<vmem>>, %arg2: memref<1x2x32xf32, #tpu.memory_space<vmem>>, %arg3: memref<824x128xf32, #tpu.memory_space<vmem>>, %arg4: memref<176x256xf32, #tpu.memory_space<vmem>>, %arg5: memref<1x9x128xf32, #tpu.memory_space<vmem>>, %arg6: memref<8x32xf32, #tpu.memory_space<vmem>>, %arg7: memref<8x128xf32, #tpu.memory_space<vmem>>) attributes {dimension_semantics = [#tpu.dimension_semantics<parallel>], iteration_bounds = array<i64: 2>, scalar_prefetch = 0 : i64, scratch_operands = 2 : i64, tpu.core_type = #tpu.core_type<tc>, window_params = [{transform_indices = @transform_0, window_bounds = array<i64: 1, 8, 256>}, {transform_indices = @transform_1, window_bounds = array<i64: 1, 2, 32>}, {pipeline_mode = #tpu.pipeline_mode<synchronous>, transform_indices = @transform_2, window_bounds = array<i64: 824, 128>}, {pipeline_mode = #tpu.pipeline_mode<synchronous>, transform_indices = @transform_3, window_bounds = array<i64: 176, 256>}, {transform_indices = @transform_4, window_bounds = array<i64: 1, 9, 128>}]} {
    %c0 = arith.constant 0 : index
    %c0_0 = arith.constant 0 : index
    %c0_1 = arith.constant 0 : index
    %0 = vector.load %arg1[%c0, %c0_0, %c0_1] : memref<1x8x256xf32, #tpu.memory_space<vmem>>, vector<1x8x256xf32>
    %1 = vector.shape_cast %0 : vector<1x8x256xf32> to vector<8x256xf32>
    %c0_2 = arith.constant 0 : index
    %c0_3 = arith.constant 0 : index
    %2 = vector.load %arg3[%c0_2, %c0_3] : memref<824x128xf32, #tpu.memory_space<vmem>>, vector<256x128xf32>
    %cst = arith.constant dense<0.000000e+00> : vector<8x128xf32>
    %3 = tpu.matmul %1, %2, %cst {dimension_numbers = #tpu.dot_dimension_numbers<[1], [0], [0], [1], [0, 0, 1, 1], [], []>} : vector<8x256xf32>, vector<256x128xf32>, vector<8x128xf32> -> vector<8x128xf32>
    %c800 = arith.constant 800 : index
    %c0_4 = arith.constant 0 : index
    %4 = vector.load %arg3[%c800, %c0_4] : memref<824x128xf32, #tpu.memory_space<vmem>>, vector<1x128xf32>
    %5 = vector.broadcast %4 : vector<1x128xf32> to vector<8x128xf32>
    %6 = arith.addf %3, %5 : vector<8x128xf32>
    %cst_5 = arith.constant 0.000000e+00 : f32
    %7 = vector.broadcast %cst_5 : f32 to vector<8x128xf32>
    %8 = arith.maximumf %6, %7 : vector<8x128xf32>
    %c0_6 = arith.constant 0 : index
    %c0_7 = arith.constant 0 : index
    %9 = vector.load %arg4[%c0_6, %c0_7] : memref<176x256xf32, #tpu.memory_space<vmem>>, vector<128x256xf32>
    %cst_8 = arith.constant dense<0.000000e+00> : vector<8x256xf32>
    %10 = tpu.matmul %8, %9, %cst_8 {dimension_numbers = #tpu.dot_dimension_numbers<[1], [0], [0], [1], [0, 0, 1, 1], [], []>} : vector<8x128xf32>, vector<128x256xf32>, vector<8x256xf32> -> vector<8x256xf32>
    %c160 = arith.constant 160 : index
    %c0_9 = arith.constant 0 : index
    %11 = vector.load %arg4[%c160, %c0_9] : memref<176x256xf32, #tpu.memory_space<vmem>>, vector<1x256xf32>
    %12 = vector.broadcast %11 : vector<1x256xf32> to vector<8x256xf32>
    %13 = arith.addf %10, %12 : vector<8x256xf32>
    %cst_10 = arith.constant 0.000000e+00 : f32
    %14 = vector.broadcast %cst_10 : f32 to vector<8x256xf32>
    %15 = arith.maximumf %13, %14 : vector<8x256xf32>
    %c256 = arith.constant 256 : index
    %c0_11 = arith.constant 0 : index
    %16 = vector.load %arg3[%c256, %c0_11] : memref<824x128xf32, #tpu.memory_space<vmem>>, vector<256x128xf32>
    %cst_12 = arith.constant dense<0.000000e+00> : vector<8x128xf32>
    %17 = tpu.matmul %15, %16, %cst_12 {dimension_numbers = #tpu.dot_dimension_numbers<[1], [0], [0], [1], [0, 0, 1, 1], [], []>} : vector<8x256xf32>, vector<256x128xf32>, vector<8x128xf32> -> vector<8x128xf32>
    %c808 = arith.constant 808 : index
    %c0_13 = arith.constant 0 : index
    %18 = vector.load %arg3[%c808, %c0_13] : memref<824x128xf32, #tpu.memory_space<vmem>>, vector<1x128xf32>
    %19 = vector.broadcast %18 : vector<1x128xf32> to vector<8x128xf32>
    %20 = arith.addf %17, %19 : vector<8x128xf32>
    %c0_14 = arith.constant 0 : index
    %c0_15 = arith.constant 0 : index
    %21 = vector.load %arg7[%c0_14, %c0_15] : memref<8x128xf32, #tpu.memory_space<vmem>>, vector<8x128xf32>
    tpu.vector_store %arg7[%c0_14, %c0_15], %20 {strides = array<i32>} : memref<8x128xf32, #tpu.memory_space<vmem>>, vector<8x128xf32>,
    %c768 = arith.constant 768 : index
    %c0_16 = arith.constant 0 : index
    %22 = vector.load %arg3[%c768, %c0_16] : memref<824x128xf32, #tpu.memory_space<vmem>>, vector<32x128xf32>
    %c0_17 = arith.constant 0 : index
    %c0_18 = arith.constant 0 : index
    %c0_19 = arith.constant 0 : index
    %23 = vector.load %arg2[%c0_17, %c0_18, %c0_19] : memref<1x2x32xf32, #tpu.memory_space<vmem>>, vector<1x1x32xf32>
    %24 = vector.shape_cast %23 : vector<1x1x32xf32> to vector<1x32xf32>
    %c0_20 = arith.constant 0 : index
    %c1 = arith.constant 1 : index
    %c0_21 = arith.constant 0 : index
    %25 = vector.load %arg2[%c0_20, %c1, %c0_21] : memref<1x2x32xf32, #tpu.memory_space<vmem>>, vector<1x1x32xf32>
    %26 = vector.shape_cast %25 : vector<1x1x32xf32> to vector<1x32xf32>
    %c0_22 = arith.constant 0 : index
    %c0_23 = arith.constant 0 : index
    %27 = vector.load %arg7[%c0_22, %c0_23] : memref<8x128xf32, #tpu.memory_space<vmem>>, vector<1x128xf32>
    %cst_24 = arith.constant dense<0.000000e+00> : vector<1x128xf32>
    %28 = tpu.matmul %24, %22, %cst_24 {dimension_numbers = #tpu.dot_dimension_numbers<[1], [0], [0], [1], [0, 0, 1, 1], [], []>} : vector<1x32xf32>, vector<32x128xf32>, vector<1x128xf32> -> vector<1x128xf32>
    %29 = arith.addf %27, %28 : vector<1x128xf32>
    %30 = arith.negf %29 : vector<1x128xf32>
    %31 = math.exp %30 : vector<1x128xf32>
    %cst_25 = arith.constant 1.000000e+00 : f32
    %32 = vector.broadcast %cst_25 : f32 to vector<1x128xf32>
    %33 = arith.addf %32, %31 : vector<1x128xf32>
    %34 = arith.divf %32, %33 : vector<1x128xf32>
    %35 = vector.extract_strided_slice %34 {offsets = [0, 0], sizes = [1, 32], strides = [1, 1]} : vector<1x128xf32> to vector<1x32xf32>
    %36 = vector.extract_strided_slice %34 {offsets = [0, 32], sizes = [1, 32], strides = [1, 1]} : vector<1x128xf32> to vector<1x32xf32>
    %37 = vector.extract_strided_slice %34 {offsets = [0, 96], sizes = [1, 32], strides = [1, 1]} : vector<1x128xf32> to vector<1x32xf32>
    %38 = vector.extract_strided_slice %29 {offsets = [0, 64], sizes = [1, 32], strides = [1, 1]} : vector<1x128xf32> to vector<1x32xf32>
    %39 = math.tanh %38 : vector<1x32xf32>
    %40 = arith.mulf %36, %26 : vector<1x32xf32>
    %41 = arith.mulf %35, %39 : vector<1x32xf32>
    %42 = arith.addf %40, %41 : vector<1x32xf32>
    %43 = math.tanh %42 : vector<1x32xf32>
    %44 = arith.mulf %37, %43 : vector<1x32xf32>
    %c0_26 = arith.constant 0 : index
    %c0_27 = arith.constant 0 : index
    %45 = vector.load %arg6[%c0_26, %c0_27] : memref<8x32xf32, #tpu.memory_space<vmem>>, vector<1x32xf32>
    tpu.vector_store %arg6[%c0_26, %c0_27], %44 {strides = array<i32>} : memref<8x32xf32, #tpu.memory_space<vmem>>, vector<1x32xf32>,
    %c1_28 = arith.constant 1 : index
    %c0_29 = arith.constant 0 : index
    %46 = vector.load %arg7[%c1_28, %c0_29] : memref<8x128xf32, #tpu.memory_space<vmem>>, vector<1x128xf32>
    %cst_30 = arith.constant dense<0.000000e+00> : vector<1x128xf32>
    %47 = tpu.matmul %44, %22, %cst_30 {dimension_numbers = #tpu.dot_dimension_numbers<[1], [0], [0], [1], [0, 0, 1, 1], [], []>} : vector<1x32xf32>, vector<32x128xf32>, vector<1x128xf32> -> vector<1x128xf32>
    %48 = arith.addf %46, %47 : vector<1x128xf32>
    %49 = arith.negf %48 : vector<1x128xf32>
    %50 = math.exp %49 : vector<1x128xf32>
    %cst_31 = arith.constant 1.000000e+00 : f32
    %51 = vector.broadcast %cst_31 : f32 to vector<1x128xf32>
    %52 = arith.addf %51, %50 : vector<1x128xf32>
    %53 = arith.divf %51, %52 : vector<1x128xf32>
    %54 = vector.extract_strided_slice %53 {offsets = [0, 0], sizes = [1, 32], strides = [1, 1]} : vector<1x128xf32> to vector<1x32xf32>
    %55 = vector.extract_strided_slice %53 {offsets = [0, 32], sizes = [1, 32], strides = [1, 1]} : vector<1x128xf32> to vector<1x32xf32>
    %56 = vector.extract_strided_slice %53 {offsets = [0, 96], sizes = [1, 32], strides = [1, 1]} : vector<1x128xf32> to vector<1x32xf32>
    %57 = vector.extract_strided_slice %48 {offsets = [0, 64], sizes = [1, 32], strides = [1, 1]} : vector<1x128xf32> to vector<1x32xf32>
    %58 = math.tanh %57 : vector<1x32xf32>
    %59 = arith.mulf %55, %42 : vector<1x32xf32>
    %60 = arith.mulf %54, %58 : vector<1x32xf32>
    %61 = arith.addf %59, %60 : vector<1x32xf32>
    %62 = math.tanh %61 : vector<1x32xf32>
    %63 = arith.mulf %56, %62 : vector<1x32xf32>
    %c1_32 = arith.constant 1 : index
    %c0_33 = arith.constant 0 : index
    %64 = vector.load %arg6[%c1_32, %c0_33] : memref<8x32xf32, #tpu.memory_space<vmem>>, vector<1x32xf32>
    tpu.vector_store %arg6[%c1_32, %c0_33], %63 {strides = array<i32>} : memref<8x32xf32, #tpu.memory_space<vmem>>, vector<1x32xf32>,
    %c2 = arith.constant 2 : index
    %c0_34 = arith.constant 0 : index
    %65 = vector.load %arg7[%c2, %c0_34] : memref<8x128xf32, #tpu.memory_space<vmem>>, vector<1x128xf32>
    %cst_35 = arith.constant dense<0.000000e+00> : vector<1x128xf32>
    %66 = tpu.matmul %63, %22, %cst_35 {dimension_numbers = #tpu.dot_dimension_numbers<[1], [0], [0], [1], [0, 0, 1, 1], [], []>} : vector<1x32xf32>, vector<32x128xf32>, vector<1x128xf32> -> vector<1x128xf32>
    %67 = arith.addf %65, %66 : vector<1x128xf32>
    %68 = arith.negf %67 : vector<1x128xf32>
    %69 = math.exp %68 : vector<1x128xf32>
    %cst_36 = arith.constant 1.000000e+00 : f32
    %70 = vector.broadcast %cst_36 : f32 to vector<1x128xf32>
    %71 = arith.addf %70, %69 : vector<1x128xf32>
    %72 = arith.divf %70, %71 : vector<1x128xf32>
    %73 = vector.extract_strided_slice %72 {offsets = [0, 0], sizes = [1, 32], strides = [1, 1]} : vector<1x128xf32> to vector<1x32xf32>
    %74 = vector.extract_strided_slice %72 {offsets = [0, 32], sizes = [1, 32], strides = [1, 1]} : vector<1x128xf32> to vector<1x32xf32>
    %75 = vector.extract_strided_slice %72 {offsets = [0, 96], sizes = [1, 32], strides = [1, 1]} : vector<1x128xf32> to vector<1x32xf32>
    %76 = vector.extract_strided_slice %67 {offsets = [0, 64], sizes = [1, 32], strides = [1, 1]} : vector<1x128xf32> to vector<1x32xf32>
    %77 = math.tanh %76 : vector<1x32xf32>
    %78 = arith.mulf %74, %61 : vector<1x32xf32>
    %79 = arith.mulf %73, %77 : vector<1x32xf32>
    %80 = arith.addf %78, %79 : vector<1x32xf32>
    %81 = math.tanh %80 : vector<1x32xf32>
    %82 = arith.mulf %75, %81 : vector<1x32xf32>
    %c2_37 = arith.constant 2 : index
    %c0_38 = arith.constant 0 : index
    %83 = vector.load %arg6[%c2_37, %c0_38] : memref<8x32xf32, #tpu.memory_space<vmem>>, vector<1x32xf32>
    tpu.vector_store %arg6[%c2_37, %c0_38], %82 {strides = array<i32>} : memref<8x32xf32, #tpu.memory_space<vmem>>, vector<1x32xf32>,
    %c3 = arith.constant 3 : index
    %c0_39 = arith.constant 0 : index
    %84 = vector.load %arg7[%c3, %c0_39] : memref<8x128xf32, #tpu.memory_space<vmem>>, vector<1x128xf32>
    %cst_40 = arith.constant dense<0.000000e+00> : vector<1x128xf32>
    %85 = tpu.matmul %82, %22, %cst_40 {dimension_numbers = #tpu.dot_dimension_numbers<[1], [0], [0], [1], [0, 0, 1, 1], [], []>} : vector<1x32xf32>, vector<32x128xf32>, vector<1x128xf32> -> vector<1x128xf32>
    %86 = arith.addf %84, %85 : vector<1x128xf32>
    %87 = arith.negf %86 : vector<1x128xf32>
    %88 = math.exp %87 : vector<1x128xf32>
    %cst_41 = arith.constant 1.000000e+00 : f32
    %89 = vector.broadcast %cst_41 : f32 to vector<1x128xf32>
    %90 = arith.addf %89, %88 : vector<1x128xf32>
    %91 = arith.divf %89, %90 : vector<1x128xf32>
    %92 = vector.extract_strided_slice %91 {offsets = [0, 0], sizes = [1, 32], strides = [1, 1]} : vector<1x128xf32> to vector<1x32xf32>
    %93 = vector.extract_strided_slice %91 {offsets = [0, 32], sizes = [1, 32], strides = [1, 1]} : vector<1x128xf32> to vector<1x32xf32>
    %94 = vector.extract_strided_slice %91 {offsets = [0, 96], sizes = [1, 32], strides = [1, 1]} : vector<1x128xf32> to vector<1x32xf32>
    %95 = vector.extract_strided_slice %86 {offsets = [0, 64], sizes = [1, 32], strides = [1, 1]} : vector<1x128xf32> to vector<1x32xf32>
    %96 = math.tanh %95 : vector<1x32xf32>
    %97 = arith.mulf %93, %80 : vector<1x32xf32>
    %98 = arith.mulf %92, %96 : vector<1x32xf32>
    %99 = arith.addf %97, %98 : vector<1x32xf32>
    %100 = math.tanh %99 : vector<1x32xf32>
    %101 = arith.mulf %94, %100 : vector<1x32xf32>
    %c3_42 = arith.constant 3 : index
    %c0_43 = arith.constant 0 : index
    %102 = vector.load %arg6[%c3_42, %c0_43] : memref<8x32xf32, #tpu.memory_space<vmem>>, vector<1x32xf32>
    tpu.vector_store %arg6[%c3_42, %c0_43], %101 {strides = array<i32>} : memref<8x32xf32, #tpu.memory_space<vmem>>, vector<1x32xf32>,
    %c4 = arith.constant 4 : index
    %c0_44 = arith.constant 0 : index
    %103 = vector.load %arg7[%c4, %c0_44] : memref<8x128xf32, #tpu.memory_space<vmem>>, vector<1x128xf32>
    %cst_45 = arith.constant dense<0.000000e+00> : vector<1x128xf32>
    %104 = tpu.matmul %101, %22, %cst_45 {dimension_numbers = #tpu.dot_dimension_numbers<[1], [0], [0], [1], [0, 0, 1, 1], [], []>} : vector<1x32xf32>, vector<32x128xf32>, vector<1x128xf32> -> vector<1x128xf32>
    %105 = arith.addf %103, %104 : vector<1x128xf32>
    %106 = arith.negf %105 : vector<1x128xf32>
    %107 = math.exp %106 : vector<1x128xf32>
    %cst_46 = arith.constant 1.000000e+00 : f32
    %108 = vector.broadcast %cst_46 : f32 to vector<1x128xf32>
    %109 = arith.addf %108, %107 : vector<1x128xf32>
    %110 = arith.divf %108, %109 : vector<1x128xf32>
    %111 = vector.extract_strided_slice %110 {offsets = [0, 0], sizes = [1, 32], strides = [1, 1]} : vector<1x128xf32> to vector<1x32xf32>
    %112 = vector.extract_strided_slice %110 {offsets = [0, 32], sizes = [1, 32], strides = [1, 1]} : vector<1x128xf32> to vector<1x32xf32>
    %113 = vector.extract_strided_slice %110 {offsets = [0, 96], sizes = [1, 32], strides = [1, 1]} : vector<1x128xf32> to vector<1x32xf32>
    %114 = vector.extract_strided_slice %105 {offsets = [0, 64], sizes = [1, 32], strides = [1, 1]} : vector<1x128xf32> to vector<1x32xf32>
    %115 = math.tanh %114 : vector<1x32xf32>
    %116 = arith.mulf %112, %99 : vector<1x32xf32>
    %117 = arith.mulf %111, %115 : vector<1x32xf32>
    %118 = arith.addf %116, %117 : vector<1x32xf32>
    %119 = math.tanh %118 : vector<1x32xf32>
    %120 = arith.mulf %113, %119 : vector<1x32xf32>
    %c4_47 = arith.constant 4 : index
    %c0_48 = arith.constant 0 : index
    %121 = vector.load %arg6[%c4_47, %c0_48] : memref<8x32xf32, #tpu.memory_space<vmem>>, vector<1x32xf32>
    tpu.vector_store %arg6[%c4_47, %c0_48], %120 {strides = array<i32>} : memref<8x32xf32, #tpu.memory_space<vmem>>, vector<1x32xf32>,
    %c5 = arith.constant 5 : index
    %c0_49 = arith.constant 0 : index
    %122 = vector.load %arg7[%c5, %c0_49] : memref<8x128xf32, #tpu.memory_space<vmem>>, vector<1x128xf32>
    %cst_50 = arith.constant dense<0.000000e+00> : vector<1x128xf32>
    %123 = tpu.matmul %120, %22, %cst_50 {dimension_numbers = #tpu.dot_dimension_numbers<[1], [0], [0], [1], [0, 0, 1, 1], [], []>} : vector<1x32xf32>, vector<32x128xf32>, vector<1x128xf32> -> vector<1x128xf32>
    %124 = arith.addf %122, %123 : vector<1x128xf32>
    %125 = arith.negf %124 : vector<1x128xf32>
    %126 = math.exp %125 : vector<1x128xf32>
    %cst_51 = arith.constant 1.000000e+00 : f32
    %127 = vector.broadcast %cst_51 : f32 to vector<1x128xf32>
    %128 = arith.addf %127, %126 : vector<1x128xf32>
    %129 = arith.divf %127, %128 : vector<1x128xf32>
    %130 = vector.extract_strided_slice %129 {offsets = [0, 0], sizes = [1, 32], strides = [1, 1]} : vector<1x128xf32> to vector<1x32xf32>
    %131 = vector.extract_strided_slice %129 {offsets = [0, 32], sizes = [1, 32], strides = [1, 1]} : vector<1x128xf32> to vector<1x32xf32>
    %132 = vector.extract_strided_slice %129 {offsets = [0, 96], sizes = [1, 32], strides = [1, 1]} : vector<1x128xf32> to vector<1x32xf32>
    %133 = vector.extract_strided_slice %124 {offsets = [0, 64], sizes = [1, 32], strides = [1, 1]} : vector<1x128xf32> to vector<1x32xf32>
    %134 = math.tanh %133 : vector<1x32xf32>
    %135 = arith.mulf %131, %118 : vector<1x32xf32>
    %136 = arith.mulf %130, %134 : vector<1x32xf32>
    %137 = arith.addf %135, %136 : vector<1x32xf32>
    %138 = math.tanh %137 : vector<1x32xf32>
    %139 = arith.mulf %132, %138 : vector<1x32xf32>
    %c5_52 = arith.constant 5 : index
    %c0_53 = arith.constant 0 : index
    %140 = vector.load %arg6[%c5_52, %c0_53] : memref<8x32xf32, #tpu.memory_space<vmem>>, vector<1x32xf32>
    tpu.vector_store %arg6[%c5_52, %c0_53], %139 {strides = array<i32>} : memref<8x32xf32, #tpu.memory_space<vmem>>, vector<1x32xf32>,
    %c6 = arith.constant 6 : index
    %c0_54 = arith.constant 0 : index
    %141 = vector.load %arg7[%c6, %c0_54] : memref<8x128xf32, #tpu.memory_space<vmem>>, vector<1x128xf32>
    %cst_55 = arith.constant dense<0.000000e+00> : vector<1x128xf32>
    %142 = tpu.matmul %139, %22, %cst_55 {dimension_numbers = #tpu.dot_dimension_numbers<[1], [0], [0], [1], [0, 0, 1, 1], [], []>} : vector<1x32xf32>, vector<32x128xf32>, vector<1x128xf32> -> vector<1x128xf32>
    %143 = arith.addf %141, %142 : vector<1x128xf32>
    %144 = arith.negf %143 : vector<1x128xf32>
    %145 = math.exp %144 : vector<1x128xf32>
    %cst_56 = arith.constant 1.000000e+00 : f32
    %146 = vector.broadcast %cst_56 : f32 to vector<1x128xf32>
    %147 = arith.addf %146, %145 : vector<1x128xf32>
    %148 = arith.divf %146, %147 : vector<1x128xf32>
    %149 = vector.extract_strided_slice %148 {offsets = [0, 0], sizes = [1, 32], strides = [1, 1]} : vector<1x128xf32> to vector<1x32xf32>
    %150 = vector.extract_strided_slice %148 {offsets = [0, 32], sizes = [1, 32], strides = [1, 1]} : vector<1x128xf32> to vector<1x32xf32>
    %151 = vector.extract_strided_slice %148 {offsets = [0, 96], sizes = [1, 32], strides = [1, 1]} : vector<1x128xf32> to vector<1x32xf32>
    %152 = vector.extract_strided_slice %143 {offsets = [0, 64], sizes = [1, 32], strides = [1, 1]} : vector<1x128xf32> to vector<1x32xf32>
    %153 = math.tanh %152 : vector<1x32xf32>
    %154 = arith.mulf %150, %137 : vector<1x32xf32>
    %155 = arith.mulf %149, %153 : vector<1x32xf32>
    %156 = arith.addf %154, %155 : vector<1x32xf32>
    %157 = math.tanh %156 : vector<1x32xf32>
    %158 = arith.mulf %151, %157 : vector<1x32xf32>
    %c6_57 = arith.constant 6 : index
    %c0_58 = arith.constant 0 : index
    %159 = vector.load %arg6[%c6_57, %c0_58] : memref<8x32xf32, #tpu.memory_space<vmem>>, vector<1x32xf32>
    tpu.vector_store %arg6[%c6_57, %c0_58], %158 {strides = array<i32>} : memref<8x32xf32, #tpu.memory_space<vmem>>, vector<1x32xf32>,
    %c7 = arith.constant 7 : index
    %c0_59 = arith.constant 0 : index
    %160 = vector.load %arg7[%c7, %c0_59] : memref<8x128xf32, #tpu.memory_space<vmem>>, vector<1x128xf32>
    %cst_60 = arith.constant dense<0.000000e+00> : vector<1x128xf32>
    %161 = tpu.matmul %158, %22, %cst_60 {dimension_numbers = #tpu.dot_dimension_numbers<[1], [0], [0], [1], [0, 0, 1, 1], [], []>} : vector<1x32xf32>, vector<32x128xf32>, vector<1x128xf32> -> vector<1x128xf32>
    %162 = arith.addf %160, %161 : vector<1x128xf32>
    %163 = arith.negf %162 : vector<1x128xf32>
    %164 = math.exp %163 : vector<1x128xf32>
    %cst_61 = arith.constant 1.000000e+00 : f32
    %165 = vector.broadcast %cst_61 : f32 to vector<1x128xf32>
    %166 = arith.addf %165, %164 : vector<1x128xf32>
    %167 = arith.divf %165, %166 : vector<1x128xf32>
    %168 = vector.extract_strided_slice %167 {offsets = [0, 0], sizes = [1, 32], strides = [1, 1]} : vector<1x128xf32> to vector<1x32xf32>
    %169 = vector.extract_strided_slice %167 {offsets = [0, 32], sizes = [1, 32], strides = [1, 1]} : vector<1x128xf32> to vector<1x32xf32>
    %170 = vector.extract_strided_slice %167 {offsets = [0, 96], sizes = [1, 32], strides = [1, 1]} : vector<1x128xf32> to vector<1x32xf32>
    %171 = vector.extract_strided_slice %162 {offsets = [0, 64], sizes = [1, 32], strides = [1, 1]} : vector<1x128xf32> to vector<1x32xf32>
    %172 = math.tanh %171 : vector<1x32xf32>
    %173 = arith.mulf %169, %156 : vector<1x32xf32>
    %174 = arith.mulf %168, %172 : vector<1x32xf32>
    %175 = arith.addf %173, %174 : vector<1x32xf32>
    %176 = math.tanh %175 : vector<1x32xf32>
    %177 = arith.mulf %170, %176 : vector<1x32xf32>
    %c7_62 = arith.constant 7 : index
    %c0_63 = arith.constant 0 : index
    %178 = vector.load %arg6[%c7_62, %c0_63] : memref<8x32xf32, #tpu.memory_space<vmem>>, vector<1x32xf32>
    tpu.vector_store %arg6[%c7_62, %c0_63], %177 {strides = array<i32>} : memref<8x32xf32, #tpu.memory_space<vmem>>, vector<1x32xf32>,
    %c0_64 = arith.constant 0 : index
    %c0_65 = arith.constant 0 : index
    %179 = vector.load %arg6[%c0_64, %c0_65] : memref<8x32xf32, #tpu.memory_space<vmem>>, vector<8x32xf32>
    %c128 = arith.constant 128 : index
    %c0_66 = arith.constant 0 : index
    %180 = vector.load %arg4[%c128, %c0_66] : memref<176x256xf32, #tpu.memory_space<vmem>>, vector<32x256xf32>
    %cst_67 = arith.constant dense<0.000000e+00> : vector<8x256xf32>
    %181 = tpu.matmul %179, %180, %cst_67 {dimension_numbers = #tpu.dot_dimension_numbers<[1], [0], [0], [1], [0, 0, 1, 1], [], []>} : vector<8x32xf32>, vector<32x256xf32>, vector<8x256xf32> -> vector<8x256xf32>
    %c168 = arith.constant 168 : index
    %c0_68 = arith.constant 0 : index
    %182 = vector.load %arg4[%c168, %c0_68] : memref<176x256xf32, #tpu.memory_space<vmem>>, vector<1x256xf32>
    %183 = vector.broadcast %182 : vector<1x256xf32> to vector<8x256xf32>
    %184 = arith.addf %181, %183 : vector<8x256xf32>
    %cst_69 = arith.constant 0.000000e+00 : f32
    %185 = vector.broadcast %cst_69 : f32 to vector<8x256xf32>
    %186 = arith.maximumf %184, %185 : vector<8x256xf32>
    %c512 = arith.constant 512 : index
    %c0_70 = arith.constant 0 : index
    %187 = vector.load %arg3[%c512, %c0_70] : memref<824x128xf32, #tpu.memory_space<vmem>>, vector<256x128xf32>
    %cst_71 = arith.constant dense<0.000000e+00> : vector<8x128xf32>
    %188 = tpu.matmul %186, %187, %cst_71 {dimension_numbers = #tpu.dot_dimension_numbers<[1], [0], [0], [1], [0, 0, 1, 1], [], []>} : vector<8x256xf32>, vector<256x128xf32>, vector<8x128xf32> -> vector<8x128xf32>
    %c816 = arith.constant 816 : index
    %c0_72 = arith.constant 0 : index
    %189 = vector.load %arg3[%c816, %c0_72] : memref<824x128xf32, #tpu.memory_space<vmem>>, vector<1x128xf32>
    %190 = vector.broadcast %189 : vector<1x128xf32> to vector<8x128xf32>
    %191 = arith.addf %188, %190 : vector<8x128xf32>
    %c0_73 = arith.constant 0 : index
    %c0_74 = arith.constant 0 : index
    %c0_75 = arith.constant 0 : index
    %192 = vector.load %arg5[%c0_73, %c0_74, %c0_75] : memref<1x9x128xf32, #tpu.memory_space<vmem>>, vector<1x8x128xf32>
    %193 = vector.shape_cast %192 : vector<1x8x128xf32> to vector<8x128xf32>
    %194 = vector.shape_cast %191 : vector<8x128xf32> to vector<1x8x128xf32>
    tpu.vector_store %arg5[%c0_73, %c0_74, %c0_75], %194 {strides = array<i32>} : memref<1x9x128xf32, #tpu.memory_space<vmem>>, vector<1x8x128xf32>,
    %cst_76 = arith.constant 0.000000e+00 : f32
    %195 = vector.broadcast %cst_76 : f32 to vector<1x64xf32>
    %196 = tpu.concatenate %177, %175, %195 in 1 : vector<1x32xf32>, vector<1x32xf32>, vector<1x64xf32> -> vector<1x128xf32>
    %c0_77 = arith.constant 0 : index
    %c8 = arith.constant 8 : index
    %c0_78 = arith.constant 0 : index
    %197 = vector.load %arg5[%c0_77, %c8, %c0_78] : memref<1x9x128xf32, #tpu.memory_space<vmem>>, vector<1x1x128xf32>
    %198 = vector.shape_cast %197 : vector<1x1x128xf32> to vector<1x128xf32>
    %199 = vector.shape_cast %196 : vector<1x128xf32> to vector<1x1x128xf32>
    tpu.vector_store %arg5[%c0_77, %c8, %c0_78], %199 {strides = array<i32>} : memref<1x9x128xf32, #tpu.memory_space<vmem>>, vector<1x1x128xf32>,
    return
  }
  func.func @transform_0(%arg0: i32) -> (i32, i32, i32) {
    %c0_i32 = arith.constant 0 : i32
    %c0_i32_0 = arith.constant 0 : i32
    %c0_i32_1 = arith.constant 0 : i32
    return %arg0, %c0_i32, %c0_i32_0 : i32, i32, i32
  }
  func.func @transform_1(%arg0: i32) -> (i32, i32, i32) {
    %c0_i32 = arith.constant 0 : i32
    %c0_i32_0 = arith.constant 0 : i32
    %c0_i32_1 = arith.constant 0 : i32
    return %arg0, %c0_i32, %c0_i32_0 : i32, i32, i32
  }
  func.func @transform_2(%arg0: i32) -> (i32, i32) {
    %c0_i32 = arith.constant 0 : i32
    %c0_i32_0 = arith.constant 0 : i32
    %c0_i32_1 = arith.constant 0 : i32
    return %c0_i32, %c0_i32_0 : i32, i32
  }
  func.func @transform_3(%arg0: i32) -> (i32, i32) {
    %c0_i32 = arith.constant 0 : i32
    %c0_i32_0 = arith.constant 0 : i32
    %c0_i32_1 = arith.constant 0 : i32
    return %c0_i32, %c0_i32_0 : i32, i32
  }
  func.func @transform_4(%arg0: i32) -> (i32, i32, i32) {
    %c0_i32 = arith.constant 0 : i32
    %c0_i32_0 = arith.constant 0 : i32
    %c0_i32_1 = arith.constant 0 : i32
    return %arg0, %c0_i32, %c0_i32_0 : i32, i32, i32
  }
}

</mosaic_0001>

<bundles_post_ra>
// kernel: tpu_custom_call.1
= control target key start
LH: loop header
LB: loop body
LE: loop exit
PB: predicated region body
PF: predicated region fallthrough
CT: control target
= control target key end

     0   :  { %9 = vsyncpa [#allocation5], 0  ;;  %s2919_s0 = inlined_call_operand.hbm [shape: f32[2,8,256], index: 0, kind: input, shape index: {}]   ;;  %s2920_s1 = inlined_call_operand.hbm [shape: f32[2,2,32], index: 1, kind: input, shape index: {}]   ;;  %s2921_s2 = inlined_call_operand.hbm [shape: f32[824,128], index: 2, kind: input, shape index: {}]   ;;  %s2922_s3 = inlined_call_operand.hbm [shape: f32[176,256], index: 3, kind: input, shape index: {}]   ;;  %s2923_s4 = inlined_call_operand.vmem [shape: f32[2,9,128], index: 4, kind: output, shape index: {}]  }
   0x1   :  { %11 = vsyncpa [#allocation5 + $0x1], 0 }
   0x2   :  { %12 = vsyncpa [#allocation7], 0 }
   0x3   :  { %14 = vsyncpa [#allocation7 + $0x1], 0 }
   0x4   :  { %15 = vsyncpa [#allocation10], 0  ;;  %s2572_s15 = smov 0   ;;  %s2574_s16 = smov 0  }
   0x5   :  { %s2576_s17 = smov 0   ;;  %s2578_s18 = smov 0  }
   0x6 LB: > { %s2591_s19 = sadd.s32 4294967295, %s2532_s18   ;;  %p41_p0 = scmp.ne.s32.totalorder %s2524_s16, %s2520_s15  ;;  %s2532_s18 = sphi %s2578_s18, %s2940_s18   ;;  %s2528_s17 = sphi %s2576_s17, %s2939_s17   ;;  %s2524_s16 = sphi %s2574_s16, %s2938_s16   ;;  %s2520_s15 = sphi %s2572_s15, %s2937_s15  }
   0x7   : > { %p2924_p1 = scmp.eq.s32.totalorder %s2591_s19, 0  ;;  %p1775_p2 = scmp.ge.s32.totalorder %s2532_s18, 1 }
   0x8   : > { %p146_p3 = scmp.lt.s32.totalorder %s2532_s18, 3  ;;  %s2534_s22 = smov [#allocation8]  }
   0x9   : > { %p2599_p4 = por %p2924_p1, %p41_p0  ;;  %s158_s23 = sshll.u32 %s2534_s22, 4  ;;  %s159_s23 = int_to_ptr.vmem [resolvable:$true] %s158_s23 }
   0xa   : > { %p2603_p5 = pnand %p1775_p2, %p146_p3  ;;  %s2535_s25 = smov [#allocation9]  }
   0xb   : > { %s2927_s20 = scalar_select %p2599_p4, 1, 0 }
   0xc   : > { %s2928_s21 = scalar_select %p2603_p5, 1, 0 }
   0xd   : > { %p2244_p6 = pneg %p2603_p5  ;;  %s171_s26 = sshll.u32 %s2535_s25, 4  ;;  %s2615_s26 = int_to_ptr.vmem [resolvable:$true] %s171_s26 }
   0xe   : > { %s2370_s29 = scalar_lea.hbm %s2921_s2, 13184 }
   0xf   : > { %p2611_p7 = pnand %p2244_p6, %p2924_p1  ;;  %p2371_p8 = scmp.ne.s32.totalorder %s2921_s2, %s2370_s29 }
  0x10   : > { %p2377_p12 = scmp.lt.u32.totalorder %s2370_s29, %s2921_s2 }
  0x11   : > { %p2372_p9 = pneg %p2611_p7 }
  0x13   : > { %p2373_p10 = pnand %p2372_p9, %p2371_p8 }
  0x15   : > { %p2374_p11 = pneg %p2373_p10 }
  0x17   : > { %p2379_p13 = pnand %p2377_p12, %p2374_p11 }
  0x19   : > { %2382 = shalt.err (!%p2379_p13)
}
  0x1a   : > { %s2383_s8 = scalar_lea.vmem %s159_s23, 13184  ;;  %p2391_p6 = scmp.lt.s32.totalorder %s159_s23, %s159_s23 }
  0x1b   : > { %p2384_p0 = scmp.ne.s32.totalorder %s159_s23, %s2383_s8  ;;  %p2392_p1 = scmp.lt.s32.totalorder %s2383_s8, %s2383_s8 }
  0x1d   : > { %p2386_p2 = pnand %p2384_p0, %p2372_p9  ;;  %p2393_p4 = por %p2392_p1, %p2391_p6 }
  0x1f   : > { %p2387_p3 = pneg %p2386_p2 }
  0x21   : > { %p2394_p5 = pnand %p2393_p4, %p2387_p3 }
  0x23   : > { %2397 = shalt.err (!%p2394_p5)
}
  0x24   : > { %s2536_s9 = smov 128   ;;  %s2537_s10 = smov 8  }
  0x25   : > { %2247 = dma.hbm_to_vmem [thread:$0]  (!%p2611_p7), %s2921_s2, 13184, %s159_s23, [#allocation7], %s2536_s9, %s2536_s9, %s2537_s10  }
  0x26   : > { %s2398_s15 = scalar_lea.hbm %s2922_s3, 5632 }
  0x27   : > { %p2399_p8 = scmp.ne.s32.totalorder %s2922_s3, %s2398_s15  ;;  %p2405_p5 = scmp.lt.u32.totalorder %s2398_s15, %s2922_s3 }
  0x29   : > { %p2401_p1 = pnand %p2399_p8, %p2372_p9 }
  0x2b   : > { %p2402_p4 = pneg %p2401_p1 }
  0x2d   : > { %p2407_p10 = pnand %p2405_p5, %p2402_p4 }
  0x2f   : > { %2410 = shalt.err (!%p2407_p10)
}
  0x30   : > { %s2411_s23 = scalar_lea.vmem %s2615_s26, 5632  ;;  %p2419_p0 = scmp.lt.s32.totalorder %s2615_s26, %s2615_s26 }
  0x31   : > { %p2412_p11 = scmp.ne.s32.totalorder %s2615_s26, %s2411_s23  ;;  %p2420_p2 = scmp.lt.s32.totalorder %s2411_s23, %s2411_s23 }
  0x33   : > { %p2414_p12 = pnand %p2412_p11, %p2372_p9  ;;  %p2421_p3 = por %p2420_p2, %p2419_p0 }
  0x35   : > { %p2415_p13 = pneg %p2414_p12 }
  0x37   : > { %p2422_p6 = pnand %p2421_p3, %p2415_p13 }
  0x39   : > { %2425 = shalt.err (!%p2422_p6)
}
  0x3a   : > { %s2538_s29 = smov 256   ;;  %s2539_s30 = smov 16  }
  0x3b   : > { %2250 = dma.hbm_to_vmem [thread:$0]  (!%p2611_p7), %s2922_s3, 5632, %s2615_s26, [#allocation10], %s2538_s29, %s2538_s29, %s2539_s30  }
  0x3c   : > { %s2665_s7 = sadd.s32 1, %s2532_s18   ;;  %s28_s9 = sadd.s32 1, %s2528_s17 }
  0x3d   : > { %s25_s8 = ssub.s32 %s2532_s18, %s2665_s7  ;;  %p35_p8 = scmp.ne.s32.totalorder %s2528_s17, %s2524_s16 }
  0x3e   : > { %p26_p9 = scmp.eq.s32.totalorder %s25_s8, 0  ;;  %p36_p1 = scmp.eq.s32.totalorder %s2532_s18, 0 }
  0x3f   : > { %p2260_p5 = scmp.lt.s32.totalorder %s2532_s18, 2  ;;  %s2678_s11 = sand.u32 1, %s2528_s17  }
  0x40   : > { %s2674_s10 = scalar_select %p26_p9, %s2528_s17, %s28_s9  }
  0x41   : > { %p37_p4 = por %p36_p1, %p35_p8  ;;  %s1813_s24 = sshll.u32 %s2532_s18, 8 }
  0x42   : > { %s1779_s12 = sshll.u32 %s2678_s11, 4  ;;  %s2685_s14 = scalar_lea.hbm %s2919_s0, %s1813_s24 }
  0x43   : > { %s189_s15 = scalar_lea.vmem [#allocation4], %s1779_s12  ;;  %p2687_p7 = pnand %p2260_p5, %p37_p4 }
  0x44   : > { %s197_s22 = sshll.u32 %s189_s15, 4  ;;  %s204_s27 = sand.u32 1, %s2532_s18   ;;  %s2691_s22 = int_to_ptr.vmem [resolvable:$true] %s197_s22 }
  0x45   : > { %s186_s28 = scalar_lea.sflag [#allocation5], %s2678_s11  ;;  %s2426_s23 = scalar_lea.hbm %s2685_s14, 256 }
  0x46   : > { %p2427_p10 = scmp.ne.s32.totalorder %s2685_s14, %s2426_s23  ;;  %p2428_p11 = pneg %p2687_p7 }
  0x47   : > { %s2431_s5 = scalar_lea.hbm %s2919_s0, 512  ;;  %p2432_p0 = scmp.lt.u32.totalorder %s2685_s14, %s2919_s0 }
  0x48   : > { %p2429_p12 = pnand %p2428_p11, %p2427_p10  ;;  %p2433_p2 = scmp.lt.u32.totalorder %s2431_s5, %s2426_s23 }
  0x49   : > { %p2435_p6 = scmp.lt.u32.totalorder %s2426_s23, %s2685_s14 }
  0x4a   : > { %p2430_p13 = pneg %p2429_p12  ;;  %p2434_p3 = por %p2433_p2, %p2432_p0 }
  0x4c   : > { %p2436_p9 = por %p2435_p6, %p2434_p3 }
  0x4e   : > { %p2437_p8 = pnand %p2436_p9, %p2430_p13 }
  0x50   : > { %2440 = shalt.err (!%p2437_p8)
}
  0x51   : > { %s2441_s9 = scalar_lea.vmem %s2691_s22, 256  ;;  %s2540_s24 = smov [#allocation4]  }
  0x52   : > { %p2442_p1 = scmp.ne.s32.totalorder %s2691_s22, %s2441_s9  ;;  %s2446_s12 = sshll.u32 %s2540_s24, 4  ;;  %s2447_s12 = int_to_ptr.vmem [resolvable:$false] %s2446_s12 }
  0x53   : > { %s2448_s26 = scalar_lea.vmem %s2447_s12, 512  ;;  %p2449_p10 = scmp.lt.s32.totalorder %s2691_s22, %s2447_s12 }
  0x54   : > { %p2444_p4 = pnand %p2442_p1, %p2428_p11  ;;  %p2450_p12 = scmp.lt.s32.totalorder %s2448_s26, %s2441_s9 }
  0x56   : > { %p2445_p5 = pneg %p2444_p4  ;;  %p2451_p0 = por %p2450_p12, %p2449_p10 }
  0x58   : > { %p2452_p2 = pnand %p2451_p0, %p2445_p5 }
  0x5a   : > { %2455 = shalt.err (!%p2452_p2)
}
  0x5b   : > { %2254 = dma.hbm_to_vmem [thread:$0]  (!%p2687_p7), %s2685_s14, 256, %s2691_s22, %s186_s28  }
  0x5c   : > { %s1782_s13 = sshll.u32 %s2678_s11, 1  ;;  %s1783_s15 = sshll.u32 %s2532_s18, 5 }
  0x5d   : > { %s2725_s30 = scalar_lea.hbm %s2920_s1, %s1783_s15  ;;  %s208_s5 = scalar_lea.vmem [#allocation6], %s1782_s13 }
  0x5e   : > { %s215_s6 = sshll.u32 %s208_s5, 4  ;;  %s205_s8 = scalar_lea.sflag [#allocation7], %s204_s27  ;;  %s216_s6 = int_to_ptr.vmem [resolvable:$true] %s215_s6 }
  0x5f   : > { %s2456_s9 = scalar_lea.hbm %s2725_s30, 32  ;;  %s2461_s22 = scalar_lea.hbm %s2920_s1, 64 }
  0x60   : > { %p2457_p13 = scmp.ne.s32.totalorder %s2725_s30, %s2456_s9  ;;  %p2462_p9 = scmp.lt.u32.totalorder %s2725_s30, %s2920_s1 }
  0x61   : > { %p2463_p8 = scmp.lt.u32.totalorder %s2461_s22, %s2456_s9  ;;  %p2465_p4 = scmp.lt.u32.totalorder %s2456_s9, %s2725_s30 }
  0x62   : > { %p2459_p3 = pnand %p2457_p13, %p2428_p11 }
  0x63   : > { %p2464_p1 = por %p2463_p8, %p2462_p9 }
  0x64   : > { %p2460_p6 = pneg %p2459_p3 }
  0x65   : > { %p2466_p5 = por %p2465_p4, %p2464_p1 }
  0x67   : > { %p2467_p10 = pnand %p2466_p5, %p2460_p6 }
  0x69   : > { %2470 = shalt.err (!%p2467_p10)
}
  0x6a   : > { %s2471_s18 = scalar_lea.vmem %s216_s6, 32  ;;  %s2541_s27 = smov [#allocation6]  }
  0x6b   : > { %p2472_p12 = scmp.ne.s32.totalorder %s216_s6, %s2471_s18  ;;  %s2476_s12 = sshll.u32 %s2541_s27, 4  ;;  %s2477_s12 = int_to_ptr.vmem [resolvable:$false] %s2476_s12 }
  0x6c   : > { %s2478_s26 = scalar_lea.vmem %s2477_s12, 64  ;;  %p2479_p13 = scmp.lt.s32.totalorder %s216_s6, %s2477_s12 }
  0x6d   : > { %p2474_p0 = pnand %p2472_p12, %p2428_p11  ;;  %p2480_p3 = scmp.lt.s32.totalorder %s2478_s26, %s2471_s18 }
  0x6f   : > { %p2475_p2 = pneg %p2474_p0  ;;  %p2481_p8 = por %p2480_p3, %p2479_p13 }
  0x71   : > { %p2482_p9 = pnand %p2481_p8, %p2475_p2 }
  0x73   : > { %2485 = shalt.err (!%p2482_p9)
}
  0x74   : > { %2257 = dma.hbm_to_vmem [thread:$0]  (!%p2687_p7), %s2725_s30, 32, %s216_s6, %s205_s8  }
  0x75   : > { %p2931_p6 = scmp.ne.s32.totalorder %s2928_s21, 0 }
  0x76   : > { %s226_s13 = sand.u32 (!%p2931_p6), 1, %s2524_s16   ;;  %p2932_p11 = scmp.ne.s32.totalorder (!%p2931_p6), %s2927_s20, 0 }
  0x77   : > { %224 = sbr.rel (%p2931_p6) target bundleno = 6682 (0x1a1a), region = 36  ;;  %s1785_s15 = sshll.u32 (!%p2931_p6), %s226_s13, 4 }
  0x78   : > { %s227_s23 = scalar_lea.sflag (!%p2931_p6), [#allocation5], %s226_s13  ;;  %s2751_s29 = scalar_lea.vmem (!%p2931_p6), [#allocation4], %s1785_s15 }
  0x7e   : > { %2503 = dma.done.wait (%p2932_p11), %s227_s23, 256  }
  0x7f   : > { %2505 = vsyncadd (%p2932_p11), %s227_s23, 4294967040  ;;  %s235_s25 = sand.u32 1, %s2591_s19   ;;  %s1786_s5 = sshll.u32 %s226_s13, 1 }
  0x80   : > { %s236_s30 = scalar_lea.sflag [#allocation7], %s235_s25  ;;  %s2758_s6 = scalar_lea.vmem [#allocation6], %s1786_s5 }
  0x81   : > { %2507 = dma.done.wait (%p2932_p11), %s236_s30, 32  }
  0x82   : > { %2509 = vsyncadd (%p2932_p11), %s236_s30, 4294967264  ;;  %p2933_p7 = scmp.eq.s32.totalorder %s2591_s19, 0 }
  0x84   : > { %2511 = dma.done.wait (%p2933_p7), [#allocation7], 13184   ;;  %p2934_p1 = pmov %p2933_p7 }
  0x86   : > { %2513 = vsyncadd (%p2934_p1), [#allocation7], 4294954112  ;;  %p2935_p4 = pmov %p2934_p1 }
  0x87   : > { %p2936_p5 = pmov %p2934_p1 }
  0x88   : > { %2515 = dma.done.wait (%p2935_p4), [#allocation10], 5632  }
  0x89   : > { %2517 = vsyncadd (%p2936_p5), [#allocation10], 4294961664  ;;  %v300_v0 = vld [vmem:[#allocation8 + $0x80] sm:$0xff]  ;;  %v301_v1 = vld [vmem:[#allocation8 + $0x88] sm:$0xff]  ;;  %vm2544_vm0 = vmmov 0   ;;  %vm625_vm1 = vcmask 261120  }
  0x8a   : > { %v284_v2 = vld [vmem:[#allocation8] sm:$0xff]  ;;  %v2048_v3 = vpack.c.bf16 %v301_v1, %v300_v0  ;;  %v285_v4 = vld [vmem:[#allocation8 + $0x8] sm:$0xff]  ;;  %v302_v5 = vld [vmem:[#allocation8 + $0x90] sm:$0xff]  ;;  %s2545_s20 = smov 64   ;;  %s2546_s21 = smov 32   ;;  %vm732_vm2 = vcmask 253952  }
  0x8b   : > { %v303_v6 = vld [vmem:[#allocation8 + $0x98] sm:$0xff]  ;;  %v2050_v7 = vpack.c.bf16 %v285_v4, %v284_v2  ;;  %v286_v9 = vld [vmem:[#allocation8 + $0x10] sm:$0xff]  ;;  %v304_v11 = vld [vmem:[#allocation8 + $0xa0] sm:$0xff]  ;;  %p277_p10 = scmp.lt.s32.totalorder %s2591_s19, 1  ;;  %vm1662_vm3 = vcmask 523264  }
  0x8c   : > { %v2052_v8 = vpack.c.bf16 %v303_v6, %v302_v5  ;;  %v287_v10 = vld [vmem:[#allocation8 + $0x18] sm:$0xff]  ;;  %2049 = vmatprep.subr.bf16.mxu0 %v2048_v3  ;;  %v305_v12 = vld [vmem:[#allocation8 + $0xa8] sm:$0xff]  ;;  %v288_v15 = vld [vmem:[#allocation8 + $0x20] sm:$0xff] }
  0x8d   : > { %2051 = vmatpush3.bf16.msra.mxu0 %v2050_v7  ;;  %v2054_v13 = vpack.c.bf16 %v287_v10, %v286_v9  ;;  %v2056_v14 = vpack.c.bf16 %v305_v12, %v304_v11  ;;  %v289_v16 = vld [vmem:[#allocation8 + $0x28] sm:$0xff]  ;;  %v306_v17 = vld [vmem:[#allocation8 + $0xb0] sm:$0xff]  ;;  %v307_v18 = vld [vmem:[#allocation8 + $0xb8] sm:$0xff]  ;;  %s2942_s19 = smov (!%p277_p10, %s2591_s19), 1 }
  0x8e   : > { %2053 = vmatprep.subr.bf16.mxu0 %v2052_v8  ;;  %v2058_v19 = vpack.c.bf16 %v289_v16, %v288_v15  ;;  %v2060_v20 = vpack.c.bf16 %v307_v18, %v306_v17  ;;  %v290_v21 = vld [vmem:[#allocation8 + $0x30] sm:$0xff]  ;;  %v291_v22 = vld [vmem:[#allocation8 + $0x38] sm:$0xff]  ;;  %v308_v23 = vld [vmem:[#allocation8 + $0xc0] sm:$0xff]  ;;  %s1814_s8 = sshll.u32 %s2942_s19, 4 }
  0x8f   : > { %v309_v24 = vld [vmem:[#allocation8 + $0xc8] sm:$0xff]  ;;  %v292_v26 = vld [vmem:[#allocation8 + $0x40] sm:$0xff]  ;;  %v395_v29 = vld [vmem:[#allocation9 + $0x18] sm:$0xff]  ;;  %v2062_v30 = vpack.c.bf16 %v291_v22, %v290_v21  ;;  %s2894_s14 = scalar_lea.vmem %s2923_s4, %s1814_s8 }
  0x90   : > { %v283_v25 = vld [vmem:[%s2751_s29 + $0x8] sm:$0xff]  ;;  %v2064_v36 = vpack.c.bf16 %v309_v24, %v308_v23  ;;  %v282_v21 = vld [vmem:[%s2751_s29] sm:$0xff] }
  0x91   : > { %2055 = vmatpush3.bf16.msra.mxu0 %v2054_v13  ;;  %v293_v27 = vld [vmem:[#allocation8 + $0x48] sm:$0xff]  ;;  %385 = vmatprep.mubr.f32.mxu0 %v283_v25  ;;  %v393_v28 = vld [vmem:[#allocation9 + $0x8] sm:$0xff]  ;;  %v310_v31 = vld [vmem:[#allocation8 + $0xd0] sm:$0xff] }
  0x92   : > { %2057 = vmatprep.subr.bf16.mxu0 %v2056_v14  ;;  %v2080_v32 = vpack.c.bf16 %v395_v29, %v393_v28  ;;  %v392_v33 = vld [vmem:[#allocation9] sm:$0xff]  ;;  %v394_v34 = vld [vmem:[#allocation9 + $0x10] sm:$0xff]  ;;  %v397_v35 = vld [vmem:[#allocation9 + $0x28] sm:$0xff]  ;;  %v2066_v46 = vpack.c.bf16 %v293_v27, %v292_v26 }
  0x93   : > { %v2082_v37 = vpack.c.bf16 %v394_v34, %v392_v33  ;;  %v399_v38 = vld [vmem:[#allocation9 + $0x38] sm:$0xff]  ;;  %v396_v39 = vld [vmem:[#allocation9 + $0x20] sm:$0xff]  ;;  %v398_v40 = vld [vmem:[#allocation9 + $0x30] sm:$0xff]  ;;  %v2542_v34 = vmov 0.0  }
  0x94   : > { %v311_v41 = vld [vmem:[#allocation8 + $0xd8] sm:$0xff]  ;;  %2081 = vmatprep.subr.bf16.mxu1 %v2080_v32  ;;  %v2084_v42 = vpack.c.bf16 %v399_v38, %v397_v35  ;;  %v401_v43 = vld [vmem:[#allocation9 + $0x48] sm:$0xff]  ;;  %v403_v44 = vld [vmem:[#allocation9 + $0x58] sm:$0xff]  ;;  %v2086_v45 = vpack.c.bf16 %v398_v40, %v396_v39  ;;  %501 = vmatprep.mubr.f32.mxu1 %v2542_v34 }
  0x95   : > { %2059 = vmatpush3.bf16.msra.mxu0 %v2058_v19  ;;  %2083 = vmatpush1.bf16.msra.mxu1 %v2082_v37  ;;  %v294_v47 = vld [vmem:[#allocation8 + $0x50] sm:$0xff]  ;;  %v2088_v48 = vpack.c.bf16 %v403_v44, %v401_v43  ;;  %v400_v49 = vld [vmem:[#allocation9 + $0x40] sm:$0xff]  ;;  %v402_v50 = vld [vmem:[#allocation9 + $0x50] sm:$0xff]  ;;  %v2068_v51 = vpack.c.bf16 %v311_v41, %v310_v31 }
  0x96   : > { %2061 = vmatprep.subr.bf16.mxu0 %v2060_v20  ;;  %2085 = vmatprep.subr.bf16.mxu1 %v2084_v42  ;;  %v295_v52 = vld [vmem:[#allocation8 + $0x58] sm:$0xff]  ;;  %v405_v53 = vld [vmem:[#allocation9 + $0x68] sm:$0xff]  ;;  %v407_v54 = vld [vmem:[#allocation9 + $0x78] sm:$0xff]  ;;  %v2090_v57 = vpack.c.bf16 %v402_v50, %v400_v49 }
  0x97   : > { %v312_v55 = vld [vmem:[#allocation8 + $0xe0] sm:$0xff]  ;;  %v313_v56 = vld [vmem:[#allocation8 + $0xe8] sm:$0xff]  ;;  %v2070_v58 = vpack.c.bf16 %v295_v52, %v294_v47  ;;  %v2092_v60 = vpack.c.bf16 %v407_v54, %v405_v53  ;;  %v404_v61 = vld [vmem:[#allocation9 + $0x60] sm:$0xff] }
  0x98   : > { %v296_v59 = vld [vmem:[#allocation8 + $0x60] sm:$0xff]  ;;  %v406_v62 = vld [vmem:[#allocation9 + $0x70] sm:$0xff]  ;;  %v2072_v63 = vpack.c.bf16 %v313_v56, %v312_v55  ;;  %v411_v2 = vld [vmem:[#allocation9 + $0x98] sm:$0xff] }
  0x99   : > { %2063 = vmatpush3.bf16.msra.mxu0 %v2062_v30  ;;  %2087 = vmatpush1.bf16.msra.mxu1 %v2086_v45  ;;  %v297_v0 = vld [vmem:[#allocation8 + $0x68] sm:$0xff]  ;;  %v409_v1 = vld [vmem:[#allocation9 + $0x88] sm:$0xff]  ;;  %v314_v3 = vld [vmem:[#allocation8 + $0xf0] sm:$0xff]  ;;  %v2094_v5 = vpack.c.bf16 %v406_v62, %v404_v61 }
  0x9a   : > { %2065 = vmatprep.subr.bf16.mxu0 %v2064_v36  ;;  %2089 = vmatprep.subr.bf16.mxu1 %v2088_v48  ;;  %v315_v4 = vld [vmem:[#allocation8 + $0xf8] sm:$0xff]  ;;  %v2074_v6 = vpack.c.bf16 %v297_v0, %v296_v59  ;;  %v298_v7 = vld [vmem:[#allocation8 + $0x70] sm:$0xff]  ;;  %v2096_v8 = vpack.c.bf16 %v411_v2, %v409_v1  ;;  %v410_v10 = vld [vmem:[#allocation9 + $0x90] sm:$0xff] }
  0x9b   : > { %v408_v9 = vld [vmem:[#allocation9 + $0x80] sm:$0xff]  ;;  %v2076_v11 = vpack.c.bf16 %v315_v4, %v314_v3  ;;  %v413_v13 = vld [vmem:[#allocation9 + $0xa8] sm:$0xff]  ;;  %v415_v14 = vld [vmem:[#allocation9 + $0xb8] sm:$0xff] }
  0x9c   : > { %v299_v12 = vld [vmem:[#allocation8 + $0x78] sm:$0xff]  ;;  %v2098_v15 = vpack.c.bf16 %v410_v10, %v408_v9  ;;  %v2100_v17 = vpack.c.bf16 %v415_v14, %v413_v13  ;;  %v414_v19 = vld [vmem:[#allocation9 + $0xb0] sm:$0xff]  ;;  %v417_v22 = vld [vmem:[#allocation9 + $0xc8] sm:$0xff] }
  0x9d   : > { %2067 = vmatpush3.bf16.msra.mxu0 %v2066_v46  ;;  %2091 = vmatpush1.bf16.msra.mxu1 %v2090_v57  ;;  %v2078_v16 = vpack.c.bf16 %v299_v12, %v298_v7  ;;  %v412_v18 = vld [vmem:[#allocation9 + $0xa0] sm:$0xff]  ;;  %v419_v23 = vld [vmem:[#allocation9 + $0xd8] sm:$0xff]  ;;  %v418_v26 = vld [vmem:[#allocation9 + $0xd0] sm:$0xff] }
  0x9e   : > { %2069 = vmatprep.subr.bf16.mxu0 %v2068_v51  ;;  %2093 = vmatprep.subr.bf16.mxu1 %v2092_v60  ;;  %v2102_v20 = vpack.c.bf16 %v414_v19, %v412_v18  ;;  %v2104_v24 = vpack.c.bf16 %v419_v23, %v417_v22  ;;  %v416_v25 = vld [vmem:[#allocation9 + $0xc0] sm:$0xff]  ;;  %v421_v28 = vld [vmem:[#allocation9 + $0xe8] sm:$0xff]  ;;  %v423_v29 = vld [vmem:[#allocation9 + $0xf8] sm:$0xff] }
  0x9f   : > { %v2106_v27 = vpack.c.bf16 %v418_v26, %v416_v25  ;;  %v2108_v30 = vpack.c.bf16 %v423_v29, %v421_v28  ;;  %v420_v31 = vld [vmem:[#allocation9 + $0xe0] sm:$0xff]  ;;  %v422_v32 = vld [vmem:[#allocation9 + $0xf0] sm:$0xff]  ;;  %v526_v35 = vld [vmem:[#allocation8 + $0x180] sm:$0xff] }
  0xa0   : > { %v2110_v33 = vpack.c.bf16 %v422_v32, %v420_v31  ;;  %v527_v36 = vld [vmem:[#allocation8 + $0x188] sm:$0xff]  ;;  %v510_v37 = vld [vmem:[#allocation8 + $0x100] sm:$0xff]  ;;  %v528_v40 = vld [vmem:[#allocation8 + $0x190] sm:$0xff]  ;;  %v427_v32 = vlaneseq }
  0xa1   : > { %2071 = vmatpush3.bf16.msra.mxu0 %v2070_v58  ;;  %2095 = vmatpush1.bf16.msra.mxu1 %v2094_v5  ;;  %v2112_v38 = vpack.c.bf16 %v527_v36, %v526_v35  ;;  %v511_v39 = vld [vmem:[#allocation8 + $0x108] sm:$0xff]  ;;  %v529_v41 = vld [vmem:[#allocation8 + $0x198] sm:$0xff]  ;;  %v512_v44 = vld [vmem:[#allocation8 + $0x110] sm:$0xff] }
  0xa2   : > { %2073 = vmatprep.subr.bf16.mxu0 %v2072_v63  ;;  %2097 = vmatprep.subr.bf16.mxu1 %v2096_v8  ;;  %v2114_v42 = vpack.c.bf16 %v511_v39, %v510_v37  ;;  %v2116_v43 = vpack.c.bf16 %v529_v41, %v528_v40  ;;  %v513_v45 = vld [vmem:[#allocation8 + $0x118] sm:$0xff]  ;;  %v530_v46 = vld [vmem:[#allocation8 + $0x1a0] sm:$0xff]  ;;  %v531_v47 = vld [vmem:[#allocation8 + $0x1a8] sm:$0xff] }
  0xa3   : > { %v2118_v48 = vpack.c.bf16 %v513_v45, %v512_v44  ;;  %v2120_v49 = vpack.c.bf16 %v531_v47, %v530_v46  ;;  %v514_v50 = vld [vmem:[#allocation8 + $0x120] sm:$0xff]  ;;  %v515_v51 = vld [vmem:[#allocation8 + $0x128] sm:$0xff]  ;;  %v532_v52 = vld [vmem:[#allocation8 + $0x1b0] sm:$0xff] }
  0xa4   : > { %v533_v53 = vld [vmem:[#allocation8 + $0x1b8] sm:$0xff]  ;;  %v2122_v54 = vpack.c.bf16 %v515_v51, %v514_v50  ;;  %v516_v56 = vld [vmem:[#allocation8 + $0x130] sm:$0xff]  ;;  %v534_v58 = vld [vmem:[#allocation8 + $0x1c0] sm:$0xff] }
  0xa5   : > { %2075 = vmatpush3.bf16.msra.mxu0 %v2074_v6  ;;  %2099 = vmatpush1.bf16.msra.mxu1 %v2098_v15  ;;  %v2124_v55 = vpack.c.bf16 %v533_v53, %v532_v52  ;;  %v517_v57 = vld [vmem:[#allocation8 + $0x138] sm:$0xff]  ;;  %v535_v59 = vld [vmem:[#allocation8 + $0x1c8] sm:$0xff]  ;;  %v518_v62 = vld [vmem:[#allocation8 + $0x140] sm:$0xff] }
  0xa6   : > { %2077 = vmatprep.subr.bf16.mxu0 %v2076_v11  ;;  %2101 = vmatprep.subr.bf16.mxu1 %v2100_v17  ;;  %v2126_v60 = vpack.c.bf16 %v517_v57, %v516_v56  ;;  %v2128_v61 = vpack.c.bf16 %v535_v59, %v534_v58  ;;  %v519_v63 = vld [vmem:[#allocation8 + $0x148] sm:$0xff]  ;;  %v536_v0 = vld [vmem:[#allocation8 + $0x1d0] sm:$0xff]  ;;  %v537_v1 = vld [vmem:[#allocation8 + $0x1d8] sm:$0xff] }
  0xa7   : > { %v2130_v2 = vpack.c.bf16 %v519_v63, %v518_v62  ;;  %v2132_v3 = vpack.c.bf16 %v537_v1, %v536_v0  ;;  %v520_v4 = vld [vmem:[#allocation8 + $0x150] sm:$0xff]  ;;  %v521_v5 = vld [vmem:[#allocation8 + $0x158] sm:$0xff]  ;;  %v538_v6 = vld [vmem:[#allocation8 + $0x1e0] sm:$0xff] }
  0xa8   : > { %v539_v7 = vld [vmem:[#allocation8 + $0x1e8] sm:$0xff]  ;;  %v2134_v8 = vpack.c.bf16 %v521_v5, %v520_v4  ;;  %v1791_v11 = vld [vmem:[#allocation8 + $0x320] ss:$0 sm:$0xff]  ;;  %v540_v19 = vld [vmem:[#allocation8 + $0x1f0] sm:$0xff] }
  0xa9   : > { %2079 = vmatpush3.bf16.msra.mxu0 %v2078_v16  ;;  %2103 = vmatpush1.bf16.msra.mxu1 %v2102_v20  ;;  %v2136_v9 = vpack.c.bf16 %v539_v7, %v538_v6  ;;  %v522_v16 = vld [vmem:[#allocation8 + $0x160] sm:$0xff]  ;;  %v523_v17 = vld [vmem:[#allocation8 + $0x168] sm:$0xff]  ;;  %v541_v20 = vld [vmem:[#allocation8 + $0x1f8] sm:$0xff] }
  0xaa   : > { %2105 = vmatprep.subr.bf16.mxu1 %v2104_v24  ;;  %2113 = vmatprep.subr.bf16.mxu0 %v2112_v38  ;;  %v2138_v18 = vpack.c.bf16 %v523_v17, %v522_v16  ;;  %v524_v22 = vld [vmem:[#allocation8 + $0x170] sm:$0xff]  ;;  %v525_v23 = vld [vmem:[#allocation8 + $0x178] sm:$0xff]  ;;  %v618_v25 = vld [vmem:[#allocation8 + $0x300] sm:$0xff] }
  0xab   : > { %v2142_v24 = vpack.c.bf16 %v525_v23, %v524_v22  ;;  %v619_v26 = vld [vmem:[#allocation8 + $0x308] sm:$0xff]  ;;  %v620_v29 = vld [vmem:[#allocation8 + $0x310] sm:$0xff]  ;;  %v425_v36 = vld [vmem:[#allocation9 + $0x140] ss:$8 sm:$0x3] }
  0xac   : > { %386 = vmatmul.mubr.f32.vlgmr.msra.gmra.mrb[0].mxu0 %v282_v21  ;;  %v2140_v21 = vpack.c.bf16 %v541_v20, %v540_v19  ;;  %v2776_v28 = vpack.c.bf16 %v619_v26, %v618_v25  ;;  %v622_v46 = vld [vmem:[%s2758_s6] sm:$0x1]  ;;  %v623_v57 = vld [vmem:[%s2758_s6 + $0x1] sm:$0x1] }
  0xad   : > { %2107 = vmatpush1.bf16.msra.mxu1 %v2106_v27  ;;  %2115 = vmatpush3.bf16.msra.mxu0 %v2114_v42  ;;  %v2543_v27 = vmov 0.0|0.0  }
  0xae   : > { %2109 = vmatprep.subr.bf16.mxu1 %v2108_v30  ;;  %2117 = vmatprep.subr.bf16.mxu0 %v2116_v43  ;;  %v621_v30 = vld [vmem:[#allocation8 + $0x318] sm:$0xff] }
  0xaf   : > { %v2781_v31 = vpack.c.bf16 %v621_v30, %v620_v29 }
  0xb1   : > { %2111 = vmatpush1.bf16.msra.mxu1 %v2110_v33  ;;  %2119 = vmatpush3.bf16.msra.mxu0 %v2118_v48  ;;  %v2787_v33 = vshrl.u32 %v427_v32, 7  ;;  %v1792_v48 = vld [vmem:[#allocation8 + $0x328] ss:$0 sm:$0xff] }
  0xb2   : > { %2121 = vmatprep.subr.bf16.mxu0 %v2120_v49  ;;  %2150 = vmatprep.subr.bf16.mxu1 %v2543_v27 }
  0xb3   : > { %v429_v35 = vsub.s32 0, %v2787_v33  ;;  %v433_v37 = vsub.s32 1, %v2787_v33 }
  0xb5   : > { %2123 = vmatpush3.bf16.msra.mxu0 %v2122_v54  ;;  %v430_v38 = vrot.slane %v425_v36, %v429_v35  ;;  %v434_v39 = vrot.slane %v425_v36, %v433_v37 }
  0xb6   : > { %2125 = vmatprep.subr.bf16.mxu0 %v2124_v55 }
  0xb9   : > { %2127 = vmatpush3.bf16.msra.mxu0 %v2126_v60 }
  0xba   : > { %2129 = vmatprep.subr.bf16.mxu0 %v2128_v61 }
  0xbd   : > { %2131 = vmatpush3.bf16.msra.mxu0 %v2130_v2 }
  0xbe   : > { %2133 = vmatprep.subr.bf16.mxu0 %v2132_v3 }
  0xc1   : > { %2135 = vmatpush3.bf16.msra.mxu0 %v2134_v8 }
  0xc2   : > { %2137 = vmatprep.subr.bf16.mxu0 %v2136_v9 }
  0xc5   : > { %2139 = vmatpush3.bf16.msra.mxu0 %v2138_v18 }
  0xc6   : > { %2141 = vmatprep.subr.bf16.mxu0 %v2140_v21 }
  0xc9   : > { %2143 = vmatpush3.bf16.msra.mxu0 %v2142_v24 }
  0xca   : > { %2144 = vmatprep.subr.bf16.mxu0 %v2543_v27 }
 0x17f   : > { %v1847_v10 = vpop.f32.mrb[0].mxu0 }
 0x180   : > { %v1848_v12 = vpop.f32.mrb[1].mxu0 }
 0x181   : > { %v1849_v13 = vadd.f32 %v1848_v12, %v1847_v10 }
 0x183   : > { %v388_v14 = vadd.f32 %v1849_v13, %v1791_v11 }
 0x185   : > { %v391_v15 = vmax.f32 %v388_v14, 0.0 }
 0x187   : > { %502 = vmatmul.mubr.f32.vlgmr.msra.gmra.mrb[0].mxu1 %v391_v15 }
 0x188   : > { %2152 = vmatpush3.bf16.msra.mxu1 %v2776_v28  ;;  %1979 = vmatprep.mubr.msk.f32.mxu1 %vm2544_vm0, %v2542_v34 }
 0x189   : > { %2153 = vmatprep.subr.bf16.mxu1 %v2543_v27 }
 0x18c   : > { %2155 = vmatpush3.bf16.msra.mxu1 %v2781_v31 }
 0x18d   : > { %2156 = vmatprep.subr.bf16.mxu1 %v2543_v27 }
 0x25a   : > { %v503_v40 = vpop.f32.mrb[0].mxu1 }
 0x25b   : > { %v504_v41 = vadd.f32 %v503_v40, %v430_v38  ;;  %v505_v42 = vpop.f32.mrb[1].mxu1 }
 0x25c   : > { %v506_v43 = vadd.f32 %v505_v42, %v434_v39 }
 0x25d   : > { %v508_v45 = vmax.f32 %v504_v41, 0.0 }
 0x25e   : > { %v509_v44 = vmax.f32 %v506_v43, 0.0 }
 0x260   : > { %611 = vmatprep.mubr.f32.mxu0 %v509_v44 }
 0x261   : > { %612 = vmatmul.mubr.f32.vlgmr.msra.gmra.mrb[2].mxu0 %v508_v45 }
 0x262   : > { %2146 = vmatpush3.bf16.msra.mxu0 %v2776_v28  ;;  %1968 = vmatprep.mubr.msk.f32.mxu0 %vm2544_vm0, %v2542_v34 }
 0x263   : > { %2147 = vmatprep.subr.bf16.mxu0 %v2543_v27 }
 0x266   : > { %2149 = vmatpush3.bf16.msra.mxu0 %v2781_v31 }
 0x267   : > { %2168 = vmatprep.subr.bf16.mxu0 %v2543_v27 }
 0x269   : > { %1969 = vmatmul.mubr.msk.f32.vlgmr.msra.gmra.mrb[4].mxu0 %vm625_vm1, %v622_v46 }
 0x26a   : > { %2170 = vmatpush3.bf16.msra.mxu0 %v2776_v28  ;;  %2012 = vmatprep.mubr.msk.f32.mxu0 %vm2544_vm0, %v2542_v34 }
 0x26b   : > { %2171 = vmatprep.subr.bf16.mxu0 %v2543_v27 }
 0x26e   : > { %2173 = vmatpush3.bf16.msra.mxu0 %v2781_v31 }
 0x26f   : > { %2180 = vmatprep.subr.bf16.mxu0 %v2543_v27 }
 0x334   : > { %v1882_v47 = vpop.f32.mrb[2].mxu0 }
 0x335   : > { %v1883_v49 = vpop.f32.mrb[3].mxu0 }
 0x336   : > { %v1884_v50 = vadd.f32 %v1883_v49, %v1882_v47 }
 0x338   : > { %v614_v51 = vadd.f32 %v1884_v50, %v1792_v48 }
 0x33a   : > { %617 = vst [vmem:[#allocation3] sm:$0xff] %v614_v51 }
 0x33c   : > { %v695_v52 = vpop.f32.mrb[4].mxu0 }
 0x33d   : > { %v1970_v53 = vpop.f32.mrb[5].mxu0 }
 0x341   : > { %v624_v54 = vld [vmem:[#allocation3] sm:$0x1]  ;;  %v734_v8 = vld [vmem:[#allocation3 + $0x1] sm:$0x1]  ;;  %v837_v26 = vld [vmem:[#allocation3 + $0x2] sm:$0x1] }
 0x342   : > { %v699_v55 = vadd.f32 %v695_v52, %v624_v54  ;;  %v940_v51 = vld [vmem:[#allocation3 + $0x3] sm:$0x1] }
 0x344   : > { %2306 = vtanh.f32 %v699_v55  ;;  %v1794_v58 = vmul.f32 -1.442695, %v699_v55 }
 0x346   : > { %2308 = vpow2.f32 %v1794_v58 }
 0x34e   : > { %v2307_v56 = vpop.eup %2306 }
 0x34f   : > { %713 = vrot.lane.b32.xlu0 %v2307_v56, %s2545_s20 }
 0x350   : > { %v2309_v59 = vpop.eup %2308 }
 0x351   : > { %v703_v60 = vadd.f32 1.0, %v2309_v59 }
 0x353   : > { %708 = vrot.lane.b32.xlu0 %v623_v57, %s2546_s21  ;;  %2310 = vrcp.f32 %v703_v60 }
 0x35d   : > { %v2311_v61 = vpop.eup %2310 }
 0x3c1   : > { %v714_v62 = vpop.permute.xlu0 %713 }
 0x3c2   : > { %v716_v63 = vmul.f32 %v2311_v61, %v714_v62 }
 0x3c4   : > { %718 = vrot.lane.b32.xlu1 %v716_v63, %s2546_s21 }
 0x3c5   : > { %v709_v0 = vpop.permute.xlu0 %708 }
 0x3c6   : > { %v711_v1 = vmul.f32 %v2311_v61, %v709_v0 }
 0x436   : > { %v719_v2 = vpop.permute.xlu1 %718 }
 0x437   : > { %v721_v3 = vadd.f32 %v719_v2, %v711_v1 }
 0x439   : > { %2312 = vtanh.f32 %v721_v3 }
 0x443   : > { %v2313_v4 = vpop.eup %2312 }
 0x444   : > { %724 = vrot.lane.b32.xlu1 %v2313_v4, %s2545_s20 }
 0x4b6   : > { %v725_v5 = vpop.permute.xlu1 %724 }
 0x4b7   : > { %v727_v6 = vmul.f32 %v2311_v61, %v725_v5  ;;  %v1043_v5 = vld [vmem:[#allocation3 + $0x4] sm:$0x1] }
 0x4b9   : > { %729 = vrot.lane.b32.xlu0 %v727_v6, %s2546_s21 }
 0x52b   : > { %v730_v7 = vpop.permute.xlu0 %729 }
 0x52c   : > { %733 = vst.msk [vmem:[#allocation2] sm:$0x1] %vm732_vm2, %v730_v7  ;;  %1980 = vmatmul.mubr.msk.f32.vlgmr.msra.gmra.mrb[2].mxu1 %vm625_vm1, %v730_v7 }
 0x52d   : > { %2158 = vmatpush3.bf16.msra.mxu1 %v2776_v28  ;;  %1990 = vmatprep.mubr.msk.f32.mxu1 %vm2544_vm0, %v2542_v34 }
 0x52e   : > { %2159 = vmatprep.subr.bf16.mxu1 %v2543_v27 }
 0x531   : > { %2161 = vmatpush3.bf16.msra.mxu1 %v2781_v31 }
 0x532   : > { %2162 = vmatprep.subr.bf16.mxu1 %v2543_v27 }
 0x5ff   : > { %v803_v9 = vpop.f32.mrb[2].mxu1 }
 0x600   : > { %v807_v10 = vadd.f32 %v803_v9, %v734_v8  ;;  %v1981_v11 = vpop.f32.mrb[3].mxu1 }
 0x602   : > { %2314 = vtanh.f32 %v807_v10  ;;  %v1796_v13 = vmul.f32 -1.442695, %v807_v10 }
 0x604   : > { %2316 = vpow2.f32 %v1796_v13 }
 0x60c   : > { %v2315_v12 = vpop.eup %2314 }
 0x60d   : > { %817 = vrot.lane.b32.xlu1 %v2315_v12, %s2545_s20 }
 0x60e   : > { %v2317_v14 = vpop.eup %2316 }
 0x60f   : > { %v811_v15 = vadd.f32 1.0, %v2317_v14 }
 0x611   : > { %2318 = vrcp.f32 %v811_v15 }
 0x61b   : > { %v2319_v16 = vpop.eup %2318 }
 0x61c   : > { %v815_v19 = vmul.f32 %v2319_v16, %v721_v3 }
 0x67f   : > { %v818_v17 = vpop.permute.xlu1 %817 }
 0x680   : > { %v820_v18 = vmul.f32 %v2319_v16, %v818_v17 }
 0x682   : > { %822 = vrot.lane.b32.xlu0 %v820_v18, %s2546_s21 }
 0x6f4   : > { %v823_v20 = vpop.permute.xlu0 %822 }
 0x6f5   : > { %v825_v21 = vadd.f32 %v823_v20, %v815_v19 }
 0x6f7   : > { %2320 = vtanh.f32 %v825_v21 }
 0x701   : > { %v2321_v22 = vpop.eup %2320 }
 0x702   : > { %828 = vrot.lane.b32.xlu1 %v2321_v22, %s2545_s20 }
 0x774   : > { %v829_v23 = vpop.permute.xlu1 %828 }
 0x775   : > { %v831_v24 = vmul.f32 %v2319_v16, %v829_v23  ;;  %v1146_v23 = vld [vmem:[#allocation3 + $0x5] sm:$0x1] }
 0x777   : > { %833 = vrot.lane.b32.xlu0 %v831_v24, %s2546_s21 }
 0x7e9   : > { %v834_v25 = vpop.permute.xlu0 %833 }
 0x7ea   : > { %836 = vst.msk [vmem:[#allocation2 + $0x1] sm:$0x1] %vm732_vm2, %v834_v25  ;;  %1991 = vmatmul.mubr.msk.f32.vlgmr.msra.gmra.mrb[4].mxu1 %vm625_vm1, %v834_v25 }
 0x7eb   : > { %2164 = vmatpush3.bf16.msra.mxu1 %v2776_v28  ;;  %2001 = vmatprep.mubr.msk.f32.mxu1 %vm2544_vm0, %v2542_v34 }
 0x7ec   : > { %2165 = vmatprep.subr.bf16.mxu1 %v2543_v27 }
 0x7ef   : > { %2167 = vmatpush3.bf16.msra.mxu1 %v2781_v31 }
 0x7f0   : > { %2174 = vmatprep.subr.bf16.mxu1 %v2543_v27 }
 0x8bd   : > { %v906_v29 = vpop.f32.mrb[4].mxu1 }
 0x8be   : > { %v910_v30 = vadd.f32 %v906_v29, %v837_v26  ;;  %v1992_v32 = vpop.f32.mrb[5].mxu1 }
 0x8c0   : > { %2322 = vtanh.f32 %v910_v30  ;;  %v1798_v38 = vmul.f32 -1.442695, %v910_v30 }
 0x8c2   : > { %2324 = vpow2.f32 %v1798_v38 }
 0x8ca   : > { %v2323_v36 = vpop.eup %2322 }
 0x8cb   : > { %920 = vrot.lane.b32.xlu1 %v2323_v36, %s2545_s20 }
 0x8cc   : > { %v2325_v39 = vpop.eup %2324 }
 0x8cd   : > { %v914_v40 = vadd.f32 1.0, %v2325_v39 }
 0x8cf   : > { %2326 = vrcp.f32 %v914_v40 }
 0x8d9   : > { %v2327_v41 = vpop.eup %2326 }
 0x8da   : > { %v918_v44 = vmul.f32 %v2327_v41, %v825_v21 }
 0x93d   : > { %v921_v42 = vpop.permute.xlu1 %920 }
 0x93e   : > { %v923_v43 = vmul.f32 %v2327_v41, %v921_v42 }
 0x940   : > { %925 = vrot.lane.b32.xlu0 %v923_v43, %s2546_s21 }
 0x9b2   : > { %v926_v45 = vpop.permute.xlu0 %925 }
 0x9b3   : > { %v928_v46 = vadd.f32 %v926_v45, %v918_v44  ;;  %v1249_v45 = vld [vmem:[#allocation3 + $0x6] sm:$0x1] }
 0x9b5   : > { %2328 = vtanh.f32 %v928_v46 }
 0x9bf   : > { %v2329_v47 = vpop.eup %2328 }
 0x9c0   : > { %931 = vrot.lane.b32.xlu1 %v2329_v47, %s2545_s20 }
 0xa32   : > { %v932_v48 = vpop.permute.xlu1 %931 }
 0xa33   : > { %v934_v49 = vmul.f32 %v2327_v41, %v932_v48 }
 0xa35   : > { %936 = vrot.lane.b32.xlu0 %v934_v49, %s2546_s21 }
 0xaa7   : > { %v937_v50 = vpop.permute.xlu0 %936 }
 0xaa8   : > { %939 = vst.msk [vmem:[#allocation2 + $0x2] sm:$0x1] %vm732_vm2, %v937_v50  ;;  %2002 = vmatmul.mubr.msk.f32.vlgmr.msra.gmra.mrb[6].mxu1 %vm625_vm1, %v937_v50 }
 0xaa9   : > { %2176 = vmatpush3.bf16.msra.mxu1 %v2776_v28  ;;  %2023 = vmatprep.mubr.msk.f32.mxu1 %vm2544_vm0, %v2542_v34 }
 0xaaa   : > { %2177 = vmatprep.subr.bf16.mxu1 %v2543_v27 }
 0xaad   : > { %2179 = vmatpush3.bf16.msra.mxu1 %v2781_v31 }
 0xaae   : > { %2186 = vmatprep.subr.bf16.mxu1 %v2543_v27 }
 0xb7b   : > { %v1009_v52 = vpop.f32.mrb[6].mxu1 }
 0xb7c   : > { %v1013_v53 = vadd.f32 %v1009_v52, %v940_v51  ;;  %v2003_v54 = vpop.f32.mrb[7].mxu1 }
 0xb7e   : > { %2330 = vtanh.f32 %v1013_v53  ;;  %v1800_v56 = vmul.f32 -1.442695, %v1013_v53 }
 0xb80   : > { %2332 = vpow2.f32 %v1800_v56 }
 0xb88   : > { %v2331_v55 = vpop.eup %2330 }
 0xb89   : > { %1023 = vrot.lane.b32.xlu1 %v2331_v55, %s2545_s20 }
 0xb8a   : > { %v2333_v57 = vpop.eup %2332 }
 0xb8b   : > { %v1017_v58 = vadd.f32 1.0, %v2333_v57 }
 0xb8d   : > { %2334 = vrcp.f32 %v1017_v58 }
 0xb97   : > { %v2335_v59 = vpop.eup %2334 }
 0xb98   : > { %v1021_v62 = vmul.f32 %v2335_v59, %v928_v46 }
 0xbfb   : > { %v1024_v60 = vpop.permute.xlu1 %1023 }
 0xbfc   : > { %v1026_v61 = vmul.f32 %v2335_v59, %v1024_v60 }
 0xbfe   : > { %1028 = vrot.lane.b32.xlu0 %v1026_v61, %s2546_s21 }
 0xc70   : > { %v1029_v63 = vpop.permute.xlu0 %1028 }
 0xc71   : > { %v1031_v0 = vadd.f32 %v1029_v63, %v1021_v62  ;;  %v1352_v62 = vld [vmem:[#allocation3 + $0x7] sm:$0x1] }
 0xc73   : > { %2336 = vtanh.f32 %v1031_v0 }
 0xc7d   : > { %v2337_v1 = vpop.eup %2336 }
 0xc7e   : > { %1034 = vrot.lane.b32.xlu1 %v2337_v1, %s2545_s20 }
 0xcf0   : > { %v1035_v2 = vpop.permute.xlu1 %1034 }
 0xcf1   : > { %v1037_v3 = vmul.f32 %v2335_v59, %v1035_v2 }
 0xcf3   : > { %1039 = vrot.lane.b32.xlu0 %v1037_v3, %s2546_s21 }
 0xd65   : > { %v1040_v4 = vpop.permute.xlu0 %1039 }
 0xd66   : > { %1042 = vst.msk [vmem:[#allocation2 + $0x3] sm:$0x1] %vm732_vm2, %v1040_v4  ;;  %2013 = vmatmul.mubr.msk.f32.vlgmr.msra.gmra.mrb[6].mxu0 %vm625_vm1, %v1040_v4 }
 0xd67   : > { %2182 = vmatpush3.bf16.msra.mxu0 %v2776_v28  ;;  %2034 = vmatprep.mubr.msk.f32.mxu0 %vm2544_vm0, %v2542_v34 }
 0xd68   : > { %2183 = vmatprep.subr.bf16.mxu0 %v2543_v27 }
 0xd6b   : > { %2185 = vmatpush3.bf16.msra.mxu0 %v2781_v31 }
 0xe39   : > { %v1112_v6 = vpop.f32.mrb[6].mxu0 }
 0xe3a   : > { %v1116_v7 = vadd.f32 %v1112_v6, %v1043_v5  ;;  %v2014_v8 = vpop.f32.mrb[7].mxu0 }
 0xe3c   : > { %2338 = vtanh.f32 %v1116_v7  ;;  %v1802_v10 = vmul.f32 -1.442695, %v1116_v7 }
 0xe3e   : > { %2340 = vpow2.f32 %v1802_v10 }
 0xe46   : > { %v2339_v9 = vpop.eup %2338 }
 0xe47   : > { %1126 = vrot.lane.b32.xlu1 %v2339_v9, %s2545_s20 }
 0xe48   : > { %v2341_v11 = vpop.eup %2340 }
 0xe49   : > { %v1120_v12 = vadd.f32 1.0, %v2341_v11 }
 0xe4b   : > { %2342 = vrcp.f32 %v1120_v12 }
 0xe55   : > { %v2343_v13 = vpop.eup %2342 }
 0xe56   : > { %v1124_v16 = vmul.f32 %v2343_v13, %v1031_v0 }
 0xeb9   : > { %v1127_v14 = vpop.permute.xlu1 %1126 }
 0xeba   : > { %v1129_v15 = vmul.f32 %v2343_v13, %v1127_v14  ;;  %v1459_v14 = vld [vmem:[#allocation9 + $0x118] sm:$0xff] }
 0xebc   : > { %1131 = vrot.lane.b32.xlu0 %v1129_v15, %s2546_s21 }
 0xf2e   : > { %v1132_v17 = vpop.permute.xlu0 %1131 }
 0xf2f   : > { %v1134_v18 = vadd.f32 %v1132_v17, %v1124_v16  ;;  %v1456_v16 = vld [vmem:[#allocation9 + $0x100] sm:$0xff]  ;;  %v1458_v17 = vld [vmem:[#allocation9 + $0x110] sm:$0xff] }
 0xf31   : > { %2344 = vtanh.f32 %v1134_v18 }
 0xf3b   : > { %v2345_v19 = vpop.eup %2344 }
 0xf3c   : > { %1137 = vrot.lane.b32.xlu1 %v2345_v19, %s2545_s20  ;;  %v1461_v19 = vld [vmem:[#allocation9 + $0x128] sm:$0xff] }
 0xfae   : > { %v1138_v20 = vpop.permute.xlu1 %1137 }
 0xfaf   : > { %v1140_v21 = vmul.f32 %v2343_v13, %v1138_v20  ;;  %v1457_v13 = vld [vmem:[#allocation9 + $0x108] sm:$0xff]  ;;  %v1463_v20 = vld [vmem:[#allocation9 + $0x138] sm:$0xff] }
 0xfb0   : > { %v2192_v15 = vpack.c.bf16 %v1459_v14, %v1457_v13  ;;  %v1583_v13 = vld [vmem:[#allocation8 + $0x2f0] sm:$0xff]  ;;  %v1584_v14 = vld [vmem:[#allocation8 + $0x2f8] sm:$0xff] }
 0xfb1   : > { %1142 = vrot.lane.b32.xlu0 %v1140_v21, %s2546_s21  ;;  %v1460_v21 = vld [vmem:[#allocation9 + $0x120] sm:$0xff] }
 0xfb2   : > { %2193 = vmatprep.subr.bf16.mxu0 %v2192_v15  ;;  %v2228_v15 = vpack.c.bf16 %v1584_v14, %v1583_v13 }
0x1023   : > { %v1143_v22 = vpop.permute.xlu0 %1142 }
0x1024   : > { %1145 = vst.msk [vmem:[#allocation2 + $0x4] sm:$0x1] %vm732_vm2, %v1143_v22  ;;  %2024 = vmatmul.mubr.msk.f32.vlgmr.msra.gmra.mrb[8].mxu1 %vm625_vm1, %v1143_v22  ;;  %v2196_v22 = vpack.c.bf16 %v1463_v20, %v1461_v19  ;;  %v1465_v19 = vld [vmem:[#allocation9 + $0x150] ss:$8 sm:$0x3] }
0x1025   : > { %2188 = vmatpush3.bf16.msra.mxu1 %v2776_v28  ;;  %2045 = vmatprep.mubr.msk.f32.mxu1 %vm2544_vm0, %v2542_v34  ;;  %v1474_v20 = vrot.slane %v1465_v19, %v433_v37 }
0x1026   : > { %2189 = vmatprep.subr.bf16.mxu1 %v2543_v27 }
0x1029   : > { %2191 = vmatpush3.bf16.msra.mxu1 %v2781_v31 }
0x10f7   : > { %v1215_v24 = vpop.f32.mrb[8].mxu1 }
0x10f8   : > { %v1219_v25 = vadd.f32 %v1215_v24, %v1146_v23  ;;  %v2025_v26 = vpop.f32.mrb[9].mxu1  ;;  %v1462_v23 = vld [vmem:[#allocation9 + $0x130] sm:$0xff] }
0x10f9   : > { %v2198_v24 = vpack.c.bf16 %v1462_v23, %v1460_v21  ;;  %v1570_v26 = vld [vmem:[#allocation8 + $0x288] sm:$0xff] }
0x10fa   : > { %2346 = vtanh.f32 %v1219_v25  ;;  %v1804_v30 = vmul.f32 -1.442695, %v1219_v25  ;;  %v1569_v25 = vld [vmem:[#allocation8 + $0x280] sm:$0xff] }
0x10fc   : > { %2348 = vpow2.f32 %v1804_v30  ;;  %v2200_v30 = vpack.c.bf16 %v1570_v26, %v1569_v25 }
0x10fe   : > { %2201 = vmatprep.subr.bf16.mxu1 %v2200_v30  ;;  %v1810_v30 = vld [vmem:[#allocation8 + $0x330] ss:$0 sm:$0xff] }
0x1104   : > { %v2347_v29 = vpop.eup %2346 }
0x1105   : > { %1229 = vrot.lane.b32.xlu1 %v2347_v29, %s2545_s20  ;;  %v1553_v29 = vld [vmem:[#allocation8 + $0x200] sm:$0xff] }
0x1106   : > { %v2349_v32 = vpop.eup %2348 }
0x1107   : > { %v1223_v36 = vadd.f32 1.0, %v2349_v32  ;;  %v1554_v32 = vld [vmem:[#allocation8 + $0x208] sm:$0xff] }
0x1109   : > { %2350 = vrcp.f32 %v1223_v36  ;;  %v1571_v36 = vld [vmem:[#allocation8 + $0x290] sm:$0xff] }
0x1113   : > { %v2351_v28 = vpop.eup %2350 }
0x1114   : > { %v1227_v27 = vmul.f32 %v2351_v28, %v1134_v18  ;;  %v2194_v18 = vpack.c.bf16 %v1458_v17, %v1456_v16  ;;  %v1567_v16 = vld [vmem:[#allocation8 + $0x270] sm:$0xff]  ;;  %v1568_v17 = vld [vmem:[#allocation8 + $0x278] sm:$0xff] }
0x1177   : > { %v1230_v38 = vpop.permute.xlu1 %1229 }
0x1178   : > { %v1232_v39 = vmul.f32 %v2351_v28, %v1230_v38 }
0x117a   : > { %1234 = vrot.lane.b32.xlu0 %v1232_v39, %s2546_s21  ;;  %v2202_v39 = vpack.c.bf16 %v1554_v32, %v1553_v29 }
0x11ec   : > { %v1235_v31 = vpop.permute.xlu0 %1234 }
0x11ed   : > { %v1237_v40 = vadd.f32 %v1235_v31, %v1227_v27  ;;  %v1555_v31 = vld [vmem:[#allocation8 + $0x210] sm:$0xff] }
0x11ef   : > { %2352 = vtanh.f32 %v1237_v40 }
0x11f9   : > { %v2353_v41 = vpop.eup %2352 }
0x11fa   : > { %1240 = vrot.lane.b32.xlu1 %v2353_v41, %s2545_s20  ;;  %v1573_v41 = vld [vmem:[#allocation8 + $0x2a0] sm:$0xff] }
0x126c   : > { %v1241_v42 = vpop.permute.xlu1 %1240 }
0x126d   : > { %v1243_v43 = vmul.f32 %v2351_v28, %v1241_v42  ;;  %v1572_v28 = vld [vmem:[#allocation8 + $0x298] sm:$0xff] }
0x126e   : > { %v2204_v27 = vpack.c.bf16 %v1572_v28, %v1571_v36 }
0x126f   : > { %1245 = vrot.lane.b32.xlu0 %v1243_v43, %s2546_s21  ;;  %v1574_v43 = vld [vmem:[#allocation8 + $0x2a8] sm:$0xff] }
0x12e1   : > { %v1246_v44 = vpop.permute.xlu0 %1245 }
0x12e2   : > { %1248 = vst.msk [vmem:[#allocation2 + $0x5] sm:$0x1] %vm732_vm2, %v1246_v44  ;;  %2035 = vmatmul.mubr.msk.f32.vlgmr.msra.gmra.mrb[8].mxu0 %vm625_vm1, %v1246_v44 }
0x12e3   : > { %1544 = vmatprep.mubr.f32.mxu0 %v2542_v34  ;;  %2195 = vmatpush1.bf16.msra.mxu0 %v2194_v18  ;;  %v2230_v18 = vpack.c.bf16 %v1568_v17, %v1567_v16 }
0x12e4   : > { %2197 = vmatprep.subr.bf16.mxu0 %v2196_v22 }
0x12e7   : > { %2199 = vmatpush1.bf16.msra.mxu0 %v2198_v24 }
0x13b5   : > { %v1318_v46 = vpop.f32.mrb[8].mxu0 }
0x13b6   : > { %v1322_v47 = vadd.f32 %v1318_v46, %v1249_v45  ;;  %v2036_v48 = vpop.f32.mrb[9].mxu0  ;;  %v2208_v45 = vpack.c.bf16 %v1574_v43, %v1573_v41  ;;  %v1557_v46 = vld [vmem:[#allocation8 + $0x220] sm:$0xff] }
0x13b7   : > { %v1575_v48 = vld [vmem:[#allocation8 + $0x2b0] sm:$0xff] }
0x13b8   : > { %2354 = vtanh.f32 %v1322_v47  ;;  %v1806_v50 = vmul.f32 -1.442695, %v1322_v47  ;;  %v1558_v47 = vld [vmem:[#allocation8 + $0x228] sm:$0xff] }
0x13ba   : > { %2356 = vpow2.f32 %v1806_v50  ;;  %v2210_v50 = vpack.c.bf16 %v1558_v47, %v1557_v46 }
0x13c2   : > { %v2355_v49 = vpop.eup %2354 }
0x13c3   : > { %1332 = vrot.lane.b32.xlu1 %v2355_v49, %s2545_s20  ;;  %v1576_v49 = vld [vmem:[#allocation8 + $0x2b8] sm:$0xff] }
0x13c4   : > { %v2357_v51 = vpop.eup %2356 }
0x13c5   : > { %v1326_v52 = vadd.f32 1.0, %v2357_v51  ;;  %v2212_v51 = vpack.c.bf16 %v1576_v49, %v1575_v48 }
0x13c7   : > { %2358 = vrcp.f32 %v1326_v52  ;;  %v1559_v52 = vld [vmem:[#allocation8 + $0x230] sm:$0xff] }
0x13d1   : > { %v2359_v53 = vpop.eup %2358 }
0x13d2   : > { %v1330_v56 = vmul.f32 %v2359_v53, %v1237_v40  ;;  %v1556_v40 = vld [vmem:[#allocation8 + $0x218] sm:$0xff] }
0x13d3   : > { %v2206_v44 = vpack.c.bf16 %v1556_v40, %v1555_v31 }
0x1435   : > { %v1333_v54 = vpop.permute.xlu1 %1332 }
0x1436   : > { %v1335_v55 = vmul.f32 %v2359_v53, %v1333_v54  ;;  %v1577_v54 = vld [vmem:[#allocation8 + $0x2c0] sm:$0xff] }
0x1438   : > { %1337 = vrot.lane.b32.xlu0 %v1335_v55, %s2546_s21  ;;  %v1578_v55 = vld [vmem:[#allocation8 + $0x2c8] sm:$0xff] }
0x14aa   : > { %v1338_v34 = vpop.permute.xlu0 %1337 }
0x14ab   : > { %v1340_v57 = vadd.f32 %v1338_v34, %v1330_v56  ;;  %v2216_v34 = vpack.c.bf16 %v1578_v55, %v1577_v54 }
0x14ad   : > { %2360 = vtanh.f32 %v1340_v57 }
0x14b7   : > { %v2361_v58 = vpop.eup %2360 }
0x14b8   : > { %1343 = vrot.lane.b32.xlu1 %v2361_v58, %s2545_s20  ;;  %v1562_v58 = vld [vmem:[#allocation8 + $0x248] sm:$0xff] }
0x152a   : > { %v1344_v59 = vpop.permute.xlu1 %1343 }
0x152b   : > { %v1346_v60 = vmul.f32 %v2359_v53, %v1344_v59  ;;  %v1560_v53 = vld [vmem:[#allocation8 + $0x238] sm:$0xff]  ;;  %v1579_v59 = vld [vmem:[#allocation8 + $0x2d0] sm:$0xff] }
0x152c   : > { %v2214_v56 = vpack.c.bf16 %v1560_v53, %v1559_v52 }
0x152d   : > { %1348 = vrot.lane.b32.xlu0 %v1346_v60, %s2546_s21  ;;  %v1580_v60 = vld [vmem:[#allocation8 + $0x2d8] sm:$0xff] }
0x159f   : > { %v1349_v61 = vpop.permute.xlu0 %1348 }
0x15a0   : > { %1351 = vst.msk [vmem:[#allocation2 + $0x6] sm:$0x1] %vm732_vm2, %v1349_v61  ;;  %2046 = vmatmul.mubr.msk.f32.vlgmr.msra.gmra.mrb[10].mxu1 %vm625_vm1, %v1349_v61 }
0x15a1   : > { %2203 = vmatpush3.bf16.msra.mxu1 %v2202_v39 }
0x15a2   : > { %2205 = vmatprep.subr.bf16.mxu1 %v2204_v27 }
0x15a5   : > { %2207 = vmatpush3.bf16.msra.mxu1 %v2206_v44 }
0x15a6   : > { %2209 = vmatprep.subr.bf16.mxu1 %v2208_v45 }
0x15a9   : > { %2211 = vmatpush3.bf16.msra.mxu1 %v2210_v50 }
0x15aa   : > { %2213 = vmatprep.subr.bf16.mxu1 %v2212_v51 }
0x15ad   : > { %2215 = vmatpush3.bf16.msra.mxu1 %v2214_v56 }
0x15ae   : > { %2217 = vmatprep.subr.bf16.mxu1 %v2216_v34 }
0x1673   : > { %v1421_v63 = vpop.f32.mrb[10].mxu1 }
0x1674   : > { %v1425_v0 = vadd.f32 %v1421_v63, %v1352_v62  ;;  %v2047_v1 = vpop.f32.mrb[11].mxu1  ;;  %v2220_v62 = vpack.c.bf16 %v1580_v60, %v1579_v59  ;;  %v1563_v63 = vld [vmem:[#allocation8 + $0x250] sm:$0xff] }
0x1675   : > { %v1581_v1 = vld [vmem:[#allocation8 + $0x2e0] sm:$0xff] }
0x1676   : > { %2362 = vtanh.f32 %v1425_v0  ;;  %v1808_v3 = vmul.f32 -1.442695, %v1425_v0  ;;  %v1564_v0 = vld [vmem:[#allocation8 + $0x258] sm:$0xff] }
0x1678   : > { %2364 = vpow2.f32 %v1808_v3  ;;  %v2222_v3 = vpack.c.bf16 %v1564_v0, %v1563_v63 }
0x1680   : > { %v2363_v2 = vpop.eup %2362 }
0x1681   : > { %1435 = vrot.lane.b32.xlu1 %v2363_v2, %s2545_s20  ;;  %v1582_v2 = vld [vmem:[#allocation8 + $0x2e8] sm:$0xff] }
0x1682   : > { %v2365_v4 = vpop.eup %2364 }
0x1683   : > { %v1429_v5 = vadd.f32 1.0, %v2365_v4  ;;  %v2224_v4 = vpack.c.bf16 %v1582_v2, %v1581_v1 }
0x1685   : > { %2366 = vrcp.f32 %v1429_v5 }
0x168f   : > { %v2367_v6 = vpop.eup %2366 }
0x1690   : > { %v1433_v9 = vmul.f32 %v2367_v6, %v1340_v57  ;;  %v1561_v57 = vld [vmem:[#allocation8 + $0x240] sm:$0xff] }
0x1691   : > { %v2218_v61 = vpack.c.bf16 %v1562_v58, %v1561_v57 }
0x1693   : > { %2219 = vmatpush3.bf16.msra.mxu1 %v2218_v61 }
0x1694   : > { %2221 = vmatprep.subr.bf16.mxu1 %v2220_v62 }
0x1697   : > { %2223 = vmatpush3.bf16.msra.mxu1 %v2222_v3 }
0x1698   : > { %2225 = vmatprep.subr.bf16.mxu1 %v2224_v4 }
0x16f3   : > { %v1436_v7 = vpop.permute.xlu1 %1435 }
0x16f4   : > { %v1438_v8 = vmul.f32 %v2367_v6, %v1436_v7 }
0x16f6   : > { %1440 = vrot.lane.b32.xlu0 %v1438_v8, %s2546_s21 }
0x1768   : > { %v1441_v10 = vpop.permute.xlu0 %1440 }
0x1769   : > { %v2884_v11 = vadd.f32 %v1441_v10, %v1433_v9  ;;  %v1565_v9 = vld [vmem:[#allocation8 + $0x260] sm:$0xff]  ;;  %v1566_v10 = vld [vmem:[#allocation8 + $0x268] sm:$0xff] }
0x176b   : > { %2368 = vtanh.f32 %v2884_v11 }
0x1775   : > { %v2369_v12 = vpop.eup %2368 }
0x1776   : > { %1446 = vrot.lane.b32.xlu1 %v2369_v12, %s2545_s20  ;;  %v2226_v12 = vpack.c.bf16 %v1566_v10, %v1565_v9 }
0x1778   : > { %2227 = vmatpush3.bf16.msra.mxu1 %v2226_v12 }
0x1779   : > { %2229 = vmatprep.subr.bf16.mxu1 %v2228_v15 }
0x177c   : > { %2231 = vmatpush3.bf16.msra.mxu1 %v2230_v18 }
0x17e8   : > { %v1447_v38 = vpop.permute.xlu1 %1446 }
0x17e9   : > { %v1449_v42 = vmul.f32 %v2367_v6, %v1447_v38 }
0x17eb   : > { %1451 = vrot.lane.b32.xlu0 %v1449_v42, %s2546_s21 }
0x185d   : > { %v1452_v5 = vpop.permute.xlu0 %1451 }
0x185e   : > { %1454 = vst.msk [vmem:[#allocation2 + $0x7] sm:$0x1] %vm732_vm2, %v1452_v5  ;;  %v1661_v6 = vsel %vm625_vm1, %v1452_v5, %v2884_v11  ;;  %v1470_v11 = vrot.slane %v1465_v19, %v429_v35 }
0x185f   : > { %v1663_v7 = vsel %vm1662_vm3, %v1661_v6, 0.0 }
0x1860   : > { %1664 = vst [vmem:[%s2894_s14 + $0x8] sm:$0x1] %v1663_v7 }
0x1865   : > { %v1455_v8 = vld [vmem:[#allocation2] sm:$0xff] }
0x1866   : > { %1809 = vmatmul.mubr.msk.f32.vlgmr.msra.gmra.mrb[10].mxu0 %vm625_vm1, %v1455_v8 }
0x1939   : > { %v1546_v21 = vpop.f32.mrb[10].mxu0 }
0x193a   : > { %v1547_v22 = vadd.f32 %v1546_v21, %v1470_v11  ;;  %v1548_v23 = vpop.f32.mrb[11].mxu0 }
0x193b   : > { %v1549_v24 = vadd.f32 %v1548_v23, %v1474_v20 }
0x193c   : > { %v1551_v26 = vmax.f32 %v1547_v22, 0.0 }
0x193d   : > { %v1552_v25 = vmax.f32 %v1549_v24, 0.0 }
0x193f   : > { %1654 = vmatprep.mubr.f32.mxu1 %v1552_v25 }
0x1940   : > { %1655 = vmatmul.mubr.f32.vlgmr.msra.gmra.mrb[12].mxu1 %v1551_v26 }
0x1a13   : > { %v1957_v29 = vpop.f32.mrb[12].mxu1 }
0x1a14   : > { %v1958_v32 = vpop.f32.mrb[13].mxu1 }
0x1a15   : > { %v1959_v36 = vadd.f32 %v1958_v32, %v1957_v29 }
0x1a17   : > { %v1657_v28 = vadd.f32 %v1959_v36, %v1810_v30 }
0x1a19   : > { %1660 = vst [vmem:[%s2894_s14] sm:$0xff] %v1657_v28 }
0x1a1a PF: > { %p18_p12 = scmp.ge.s32.totalorder %s2665_s7, 4   ;;  %s2937_s15 = smov %s2524_s16 }
0x1a1b   : > { %s2938_s16 = smov %s2528_s17  ;;  %s2939_s17 = smov %s2674_s10 }
0x1a1c   : > { %s2940_s18 = smov %s2665_s7  ;;  %20 = sbr.rel (!%p18_p12) target bundleno = 6 (0x6), region = 99 }
0x1a23   :  { %1686 = vsyncpa [#allocation5], 1 }
0x1a24   :  { %1688 = vsyncpa [#allocation5 + $0x1], 1 }
0x1a25   :  { %1689 = vsyncpa [#allocation7], 1 }
0x1a26   :  { %1691 = vsyncpa [#allocation7 + $0x1], 1 }
0x1a27   :  { %1692 = vsyncpa [#allocation10], 1 }

</bundles_post_ra>
